<compile_context>
chip_gen: v5e
topology: v5e:2x2
jax: 0.10.0
libtpu: 0.0.40
codegen_flags: <defaults>
</compile_context>

<pallas_src>
import functools
import math

import jax
import jax.numpy as jnp
from jax import lax
from jax.experimental import pallas as pl
from jax.experimental.pallas import tpu as pltpu


COMPUTE_DTYPE = jnp.bfloat16   # matmul input dtype (f32 accumulation)


def _round_up(x, m):
    return ((x + m - 1) // m) * m


# -----------------------------------------------------------------------------
# Fused PointNetPolylineEncoder kernel
# -----------------------------------------------------------------------------
def _pointnet_kernel(poly_ref, mask_ref, *wrefs_and_out, n_pre, n_mlp):
    """One tile of polylines, full PointNet encoder in VMEM.

    poly_ref: (T, tp, C)   time-major points for tp polylines
    mask_ref: (T, tp, 1)   float {0,1} validity of each point
    weights : n_pre pre-layers, n_mlp mlp-layers, out1, out2 (w f16/bf16, b f32)
    out     : (tp, D_out)
    """
    n_w = 2 * (n_pre + n_mlp + 2)
    w_refs = wrefs_and_out[:n_w]
    o_ref = wrefs_and_out[n_w]

    T = poly_ref.shape[0]
    cdt = w_refs[0].dtype

    def dense_relu(x, wi):
        y = jnp.dot(x.astype(cdt), w_refs[wi][...],
                    preferred_element_type=jnp.float32) + w_refs[wi + 1][...]
        return jnp.maximum(y, 0.0)

    # ---- stage 1: pre-MLP per point, masked, per-polyline max pool ----------
    feats = []
    pooled = None
    valid = None
    for t in range(T):
        x = poly_ref[t]                  # (tp, C)
        m = mask_ref[t]                  # (tp, 1)
        for l in range(n_pre):
            x = dense_relu(x, 2 * l)
        x = x * m                        # zero invalid points (matches scatter)
        feats.append(x)
        pooled = x if pooled is None else jnp.maximum(pooled, x)
        valid = m if valid is None else jnp.maximum(valid, m)

    # ---- stage 2: concat(point, pooled), MLP, masked, max pool --------------
    base = 2 * n_pre
    out = None
    for t in range(T):
        x = jnp.concatenate([feats[t], pooled], axis=-1)   # (tp, 2*hidden)
        for l in range(n_mlp):
            x = dense_relu(x, base + 2 * l)
        x = x * mask_ref[t]
        out = x if out is None else jnp.maximum(out, x)

    # ---- out-MLP, zero invalid polylines -------------------------------------
    base = 2 * (n_pre + n_mlp)
    y = dense_relu(out, base)
    y = jnp.dot(y.astype(cdt), w_refs[base + 2][...],
                preferred_element_type=jnp.float32) + w_refs[base + 3][...]
    o_ref[...] = (y * valid).astype(o_ref.dtype)


def pointnet_encoder(p, polylines, polylines_mask, tile_p=128):
    """PointNetPolylineEncoder forward. polylines:(B,P,T,C) mask:(B,P,T) bool."""
    B, P, T, C = polylines.shape
    BP = B * P
    Tp = _round_up(T, 8)                               # pad points (mask=0)
    tp = min(tile_p, _round_up(BP, 8))                 # polylines per grid step
    BPp = _round_up(BP, tp)

    poly = polylines.reshape(BP, T, C).astype(jnp.float32)
    maskf = polylines_mask.reshape(BP, T).astype(jnp.float32)
    poly = jnp.pad(poly, ((0, BPp - BP), (0, Tp - T), (0, 0)))
    maskf = jnp.pad(maskf, ((0, BPp - BP), (0, Tp - T)))

    poly_t = jnp.transpose(poly, (1, 0, 2))            # (Tp, BPp, C)
    mask_t = jnp.transpose(maskf, (1, 0))[..., None]   # (Tp, BPp, 1)

    cdt = COMPUTE_DTYPE
    w_list = []
    for (w, b) in p["pre"]:
        w_list += [w.astype(cdt), b.reshape(1, -1).astype(jnp.float32)]
    for (w, b) in p["mlps"]:
        w_list += [w.astype(cdt), b.reshape(1, -1).astype(jnp.float32)]
    w_list += [p["out1_w"].astype(cdt), p["out1_b"].reshape(1, -1).astype(jnp.float32)]
    w_list += [p["out2_w"].astype(cdt), p["out2_b"].reshape(1, -1).astype(jnp.float32)]
    D_out = p["out2_w"].shape[1]

    in_specs = [
        pl.BlockSpec((Tp, tp, C), lambda i: (0, i, 0)),
        pl.BlockSpec((Tp, tp, 1), lambda i: (0, i, 0)),
    ] + [pl.BlockSpec(w.shape, lambda i: (0, 0)) for w in w_list]

    out = pl.pallas_call(
        functools.partial(_pointnet_kernel,
                          n_pre=len(p["pre"]), n_mlp=len(p["mlps"])),
        out_shape=jax.ShapeDtypeStruct((BPp, D_out), jnp.float32),
        grid_spec=pltpu.PrefetchScalarGridSpec(
            num_scalar_prefetch=0,
            grid=(BPp // tp,),
            in_specs=in_specs,
            out_specs=pl.BlockSpec((tp, D_out), lambda i: (i, 0)),
        ),
        compiler_params=pltpu.CompilerParams(dimension_semantics=("parallel",)),
    )(poly_t, mask_t, *w_list)
    return out[:BP].reshape(B, P, D_out)


# -----------------------------------------------------------------------------
# Fused transformer encoder layer kernel (post-norm, global attention)
# -----------------------------------------------------------------------------
def _encoder_layer_kernel(src_ref, pos_ref, bias_ref,
                          wqk_ref, bqk_ref, wv_ref, bv_ref,
                          wo_ref, bo_ref, g1_ref, bb1_ref,
                          wf1_ref, bf1_ref, wf2_ref, bf2_ref,
                          g2_ref, bb2_ref, o_ref, *, nhead, eps):
    src = src_ref[0].astype(jnp.float32)      # (N, D)
    pos = pos_ref[0].astype(jnp.float32)      # (N, D)
    bias = bias_ref[0]                        # (1, N) additive key-padding bias
    N, D = src.shape
    Dh = D // nhead
    scale = 1.0 / math.sqrt(Dh)
    cdt = wqk_ref.dtype

    # fused Q/K projection (same input src+pos), separate V projection (src)
    qk_in = (src + pos).astype(cdt)
    qk = jnp.dot(qk_in, wqk_ref[...], preferred_element_type=jnp.float32) + bqk_ref[...]
    v = jnp.dot(src.astype(cdt), wv_ref[...],
                preferred_element_type=jnp.float32) + bv_ref[...]
    q = qk[:, :D]
    k = qk[:, D:]

    # multi-head attention (all heads of this batch element in one grid step)
    heads = []
    for h in range(nhead):
        qh = q[:, h * Dh:(h + 1) * Dh].astype(cdt)
        kh = k[:, h * Dh:(h + 1) * Dh].astype(cdt)
        vh = v[:, h * Dh:(h + 1) * Dh].astype(cdt)
        s = lax.dot_general(qh, kh, (((1,), (1,)), ((), ())),
                            preferred_element_type=jnp.float32) * scale  # (N, N)
        s = s + bias
        m = jnp.max(s, axis=-1, keepdims=True)
        pexp = jnp.exp(s - m)
        denom = jnp.sum(pexp, axis=-1, keepdims=True)
        pexp = pexp * pl.reciprocal(denom, approx=True)
        heads.append(jnp.dot(pexp.astype(cdt), vh,
                             preferred_element_type=jnp.float32))
    attn = jnp.concatenate(heads, axis=-1)                               # (N, D)
    attn = jnp.dot(attn.astype(cdt), wo_ref[...],
                   preferred_element_type=jnp.float32) + bo_ref[...]

    # residual + LayerNorm 1 (dropout = identity in eval)
    x = src + attn
    mean = jnp.mean(x, axis=-1, keepdims=True)
    var = jnp.mean((x - mean) ** 2, axis=-1, keepdims=True)
    x = (x - mean) * lax.rsqrt(var + eps) * g1_ref[...] + bb1_ref[...]

    # FFN (linear -> relu -> linear), intermediate stays in VMEM/vregs
    h1 = jnp.dot(x.astype(cdt), wf1_ref[...],
                 preferred_element_type=jnp.float32) + bf1_ref[...]
    h1 = jnp.maximum(h1, 0.0)
    h2 = jnp.dot(h1.astype(cdt), wf2_ref[...],
                 preferred_element_type=jnp.float32) + bf2_ref[...]

    # residual + LayerNorm 2
    y = x + h2
    mean = jnp.mean(y, axis=-1, keepdims=True)
    var = jnp.mean((y - mean) ** 2, axis=-1, keepdims=True)
    y = (y - mean) * lax.rsqrt(var + eps) * g2_ref[...] + bb2_ref[...]

    o_ref[0] = y.astype(o_ref.dtype)


def transformer_encoder_layer(src, pos, kbias, p, nhead):
    """src,pos:(B,N,D); kbias:(B,N) additive key-padding bias (0 / -1e30)."""
    B, N, D = src.shape
    cdt = COMPUTE_DTYPE
    wqk = jnp.concatenate([p["wq"], p["wk"]], axis=1).astype(cdt)      # (D, 2D)
    bqk = jnp.concatenate([p["bq"], p["bk"]], axis=0).reshape(1, 2 * D)

    args = [
        src, pos, kbias.reshape(B, 1, N),
        wqk, bqk,
        p["wv"].astype(cdt), p["bv"].reshape(1, D),
        p["wo"].astype(cdt), p["bo"].reshape(1, D),
        p["ln1_g"].reshape(1, D), p["ln1_b"].reshape(1, D),
        p["ff1_w"].astype(cdt), p["ff1_b"].reshape(1, -1),
        p["ff2_w"].astype(cdt), p["ff2_b"].reshape(1, D),
        p["ln2_g"].reshape(1, D), p["ln2_b"].reshape(1, D),
    ]
    in_specs = [
        pl.BlockSpec((1, N, D), lambda i: (i, 0, 0)),
        pl.BlockSpec((1, N, D), lambda i: (i, 0, 0)),
        pl.BlockSpec((1, 1, N), lambda i: (i, 0, 0)),
    ] + [pl.BlockSpec(a.shape, lambda i: (0, 0)) for a in args[3:]]

    return pl.pallas_call(
        functools.partial(_encoder_layer_kernel, nhead=nhead, eps=1e-5),
        out_shape=jax.ShapeDtypeStruct((B, N, D), jnp.float32),
        grid_spec=pltpu.PrefetchScalarGridSpec(
            num_scalar_prefetch=0,
            grid=(B,),
            in_specs=in_specs,
            out_specs=pl.BlockSpec((1, N, D), lambda i: (i, 0, 0)),
        ),
        compiler_params=pltpu.CompilerParams(dimension_semantics=("parallel",)),
    )(*args)


# -----------------------------------------------------------------------------
# Plain-JAX glue (position embedding, concatenations, final gather)
# -----------------------------------------------------------------------------
def gen_sineembed_for_position(pos_xy, hidden_dim):
    """pos_xy:(B,N,2) -> (B,N,hidden_dim).  Mirrors DAB-DETR sine embedding."""
    half = hidden_dim // 2
    scale = 2.0 * math.pi
    dim_t = jnp.arange(half, dtype=jnp.float32)
    dim_t = 10000.0 ** (2.0 * jnp.floor(dim_t / 2.0) / half)
    x_embed = pos_xy[..., 0] * scale
    y_embed = pos_xy[..., 1] * scale
    pos_x = x_embed[..., None] / dim_t
    pos_y = y_embed[..., None] / dim_t

    def interleave(p):
        s = jnp.sin(p[..., 0::2])
        c = jnp.cos(p[..., 1::2])
        return jnp.stack([s, c], axis=-1).reshape(p.shape[:-1] + (-1,))

    return jnp.concatenate([interleave(pos_y), interleave(pos_x)], axis=-1)


def mtr_encoder_forward(params, cfg, input_dict):
    obj_trajs = input_dict["obj_trajs"]
    obj_trajs_mask = input_dict["obj_trajs_mask"]
    map_polylines = input_dict["map_polylines"]
    map_polylines_mask = input_dict["map_polylines_mask"]
    obj_trajs_last_pos = input_dict["obj_trajs_last_pos"]
    map_polylines_center = input_dict["map_polylines_center"]
    track_index_to_predict = input_dict["track_index_to_predict"]

    num_center_objects, num_objects, _, _ = obj_trajs.shape
    num_polylines = map_polylines.shape[1]

    obj_trajs_in = jnp.concatenate(
        [obj_trajs, obj_trajs_mask[..., None].astype(obj_trajs.dtype)], axis=-1
    )
    obj_feat = pointnet_encoder(params["agent_enc"], obj_trajs_in, obj_trajs_mask)
    map_feat = pointnet_encoder(params["map_enc"], map_polylines, map_polylines_mask)

    obj_valid_mask = obj_trajs_mask.sum(axis=-1) > 0
    map_valid_mask = map_polylines_mask.sum(axis=-1) > 0

    global_feat = jnp.concatenate([obj_feat, map_feat], axis=1)
    global_mask = jnp.concatenate([obj_valid_mask, map_valid_mask], axis=1)
    global_pos = jnp.concatenate([obj_trajs_last_pos, map_polylines_center], axis=1)

    # global attention (apply_global_attn); reference asserts >=1 valid token.
    pos_embedding = gen_sineembed_for_position(global_pos[..., :2], cfg.D_MODEL)
    kbias = jnp.where(global_mask, 0.0, -1e30).astype(jnp.float32)   # (B, N)
    x = global_feat
    for layer_p in params["attn_layers"]:
        x = transformer_encoder_layer(x, pos_embedding, kbias, layer_p,
                                      cfg.NUM_ATTN_HEAD)
    global_feat = x

    obj_feat_out = global_feat[:, :num_objects]
    map_feat_out = global_feat[:, num_objects:]
    assert map_feat_out.shape[1] == num_polylines
    center_objects_feature = obj_feat_out[
        jnp.arange(num_center_objects), track_index_to_predict
    ]

    return {
        "center_objects_feature": center_objects_feature,
        "obj_feature": obj_feat_out,
        "map_feature": map_feat_out,
        "obj_mask": obj_valid_mask,
        "map_mask": map_valid_mask,
        "obj_pos": obj_trajs_last_pos,
        "map_pos": map_polylines_center,
    }


# -----------------------------------------------------------------------------
# Deterministic parameter initialization
# -----------------------------------------------------------------------------
def _init_linear(key, cin, cout):
    kw, kb = jax.random.split(key)
    w = jax.random.normal(kw, (cin, cout), jnp.float32) / math.sqrt(cin)
    b = 0.01 * jax.random.normal(kb, (cout,), jnp.float32)
    return w, b


def _init_linear_bn(key, cin, cout, eps=1e-5):
    """Linear(no bias) + BatchNorm1d(eval, running_mean=0, running_var=1) folded."""
    kw, kg, kb = jax.random.split(key, 3)
    w = jax.random.normal(kw, (cin, cout), jnp.float32) / math.sqrt(cin)
    gamma = 1.0 + 0.1 * jax.random.normal(kg, (cout,), jnp.float32)
    beta = 0.1 * jax.random.normal(kb, (cout,), jnp.float32)
    scale = gamma / jnp.sqrt(1.0 + eps)
    return w * scale[None, :], beta


def init_pointnet_params(key, in_channels, hidden_dim, num_layers, num_pre_layers,
                         out_channels):
    keys = jax.random.split(key, num_layers + 2)
    pre = []
    cin = in_channels
    for k in range(num_pre_layers):
        pre.append(_init_linear_bn(keys[k], cin, hidden_dim))
        cin = hidden_dim
    mlps = []
    cin = hidden_dim * 2
    for k in range(num_layers - num_pre_layers):
        mlps.append(_init_linear_bn(keys[num_pre_layers + k], cin, hidden_dim))
        cin = hidden_dim
    out1_w, out1_b = _init_linear(keys[num_layers], hidden_dim, hidden_dim)
    out2_w, out2_b = _init_linear(keys[num_layers + 1], hidden_dim, out_channels)
    return {"pre": pre, "mlps": mlps,
            "out1_w": out1_w, "out1_b": out1_b,
            "out2_w": out2_w, "out2_b": out2_b}


def init_transformer_layer_params(key, d_model, nhead):
    dim_ff = d_model * 4
    keys = jax.random.split(key, 10)
    wq, bq = _init_linear(keys[0], d_model, d_model)
    wk, bk = _init_linear(keys[1], d_model, d_model)
    wv, bv = _init_linear(keys[2], d_model, d_model)
    wo, bo = _init_linear(keys[3], d_model, d_model)
    ff1_w, ff1_b = _init_linear(keys[4], d_model, dim_ff)
    ff2_w, ff2_b = _init_linear(keys[5], dim_ff, d_model)
    ln1_g = 1.0 + 0.01 * jax.random.normal(keys[6], (d_model,), jnp.float32)
    ln1_b = 0.01 * jax.random.normal(keys[7], (d_model,), jnp.float32)
    ln2_g = 1.0 + 0.01 * jax.random.normal(keys[8], (d_model,), jnp.float32)
    ln2_b = 0.01 * jax.random.normal(keys[9], (d_model,), jnp.float32)
    return {"wq": wq, "bq": bq, "wk": wk, "bk": bk, "wv": wv, "bv": bv,
            "wo": wo, "bo": bo, "ff1_w": ff1_w, "ff1_b": ff1_b,
            "ff2_w": ff2_w, "ff2_b": ff2_b,
            "ln1_g": ln1_g, "ln1_b": ln1_b, "ln2_g": ln2_g, "ln2_b": ln2_b}


def init_params(key, cfg):
    k1, k2, k3 = jax.random.split(key, 3)
    agent = init_pointnet_params(
        k1, cfg.NUM_INPUT_ATTR_AGENT + 1, cfg.NUM_CHANNEL_IN_MLP_AGENT,
        cfg.NUM_LAYER_IN_MLP_AGENT, 1, cfg.D_MODEL)
    map_enc = init_pointnet_params(
        k2, cfg.NUM_INPUT_ATTR_MAP, cfg.NUM_CHANNEL_IN_MLP_MAP,
        cfg.NUM_LAYER_IN_MLP_MAP, cfg.NUM_LAYER_IN_PRE_MLP_MAP, cfg.D_MODEL)
    attn_keys = jax.random.split(k3, cfg.NUM_ATTN_LAYERS)
    attn = [init_transformer_layer_params(k, cfg.D_MODEL, cfg.NUM_ATTN_HEAD)
            for k in attn_keys]
    return {"agent_enc": agent, "map_enc": map_enc, "attn_layers": attn}


class Cfg(dict):
    def __getattr__(self, name):
        return self[name]


# -----------------------------------------------------------------------------
if __name__ == "__main__":
    cfg = Cfg(
        NUM_INPUT_ATTR_AGENT=9, NUM_CHANNEL_IN_MLP_AGENT=32, NUM_LAYER_IN_MLP_AGENT=3,
        NUM_INPUT_ATTR_MAP=9, NUM_CHANNEL_IN_MLP_MAP=32, NUM_LAYER_IN_MLP_MAP=3,
        NUM_LAYER_IN_PRE_MLP_MAP=1, D_MODEL=32, NUM_ATTN_LAYERS=2, NUM_ATTN_HEAD=4,
        USE_LOCAL_ATTN=False,
    )

    B, NUM_OBJ, T_AG, NUM_POLY, T_MAP = 2, 6, 8, 8, 10
    key = jax.random.PRNGKey(0)
    ks = jax.random.split(key, 8)

    obj_trajs = jax.random.normal(ks[0], (B, NUM_OBJ, T_AG, cfg.NUM_INPUT_ATTR_AGENT),
                                  jnp.float32)
    obj_trajs_mask = jax.random.uniform(ks[1], (B, NUM_OBJ, T_AG)) > 0.3
    obj_trajs_mask = obj_trajs_mask.at[:, 0, :].set(True)     # >=1 valid obj per batch
    map_polylines = jax.random.normal(ks[2], (B, NUM_POLY, T_MAP, cfg.NUM_INPUT_ATTR_MAP),
                                      jnp.float32)
    map_polylines_mask = jax.random.uniform(ks[3], (B, NUM_POLY, T_MAP)) > 0.3
    map_polylines_mask = map_polylines_mask.at[:, 0, :].set(True)
    obj_trajs_last_pos = jax.random.normal(ks[4], (B, NUM_OBJ, 3), jnp.float32)
    map_polylines_center = jax.random.normal(ks[5], (B, NUM_POLY, 3), jnp.float32)
    track_index_to_predict = jnp.array([0, 1], dtype=jnp.int32)

    params = init_params(ks[6], cfg)

    input_dict = {
        "obj_trajs": obj_trajs,
        "obj_trajs_mask": obj_trajs_mask,
        "map_polylines": map_polylines,
        "map_polylines_mask": map_polylines_mask,
        "obj_trajs_last_pos": obj_trajs_last_pos,
        "map_polylines_center": map_polylines_center,
        "track_index_to_predict": track_index_to_predict,
    }

    out = mtr_encoder_forward(params, cfg, input_dict)
    jax.block_until_ready(out)

    assert out["center_objects_feature"].shape == (B, cfg.D_MODEL)
    assert out["obj_feature"].shape == (B, NUM_OBJ, cfg.D_MODEL)
    assert out["map_feature"].shape == (B, NUM_POLY, cfg.D_MODEL)
    assert bool(jnp.all(jnp.isfinite(out["center_objects_feature"])))
    print("KERNEL_OK")
</pallas_src>

<mosaic_0001>
module attributes {stable_mosaic.version = 11 : i64} {
  func.func @_pointnet_kernel(%arg0: i32, %arg1: memref<8x16x10xf32, #tpu.memory_space<vmem>>, %arg2: memref<8x16x1xf32, #tpu.memory_space<vmem>>, %arg3: memref<10x32xbf16, #tpu.memory_space<vmem>>, %arg4: memref<1x32xf32, #tpu.memory_space<vmem>>, %arg5: memref<64x32xbf16, #tpu.memory_space<vmem>>, %arg6: memref<1x32xf32, #tpu.memory_space<vmem>>, %arg7: memref<32x32xbf16, #tpu.memory_space<vmem>>, %arg8: memref<1x32xf32, #tpu.memory_space<vmem>>, %arg9: memref<32x32xbf16, #tpu.memory_space<vmem>>, %arg10: memref<1x32xf32, #tpu.memory_space<vmem>>, %arg11: memref<32x32xbf16, #tpu.memory_space<vmem>>, %arg12: memref<1x32xf32, #tpu.memory_space<vmem>>, %arg13: memref<16x32xf32, #tpu.memory_space<vmem>>) attributes {dimension_semantics = [#tpu.dimension_semantics<parallel>], iteration_bounds = array<i64: 1>, scalar_prefetch = 0 : i64, scratch_operands = 0 : i64, tpu.core_type = #tpu.core_type<tc>, window_params = [{transform_indices = @transform_0, window_bounds = array<i64: 8, 16, 10>}, {transform_indices = @transform_1, window_bounds = array<i64: 8, 16, 1>}, {pipeline_mode = #tpu.pipeline_mode<synchronous>, transform_indices = @transform_2, window_bounds = array<i64: 10, 32>}, {pipeline_mode = #tpu.pipeline_mode<synchronous>, transform_indices = @transform_3, window_bounds = array<i64: 1, 32>}, {pipeline_mode = #tpu.pipeline_mode<synchronous>, transform_indices = @transform_4, window_bounds = array<i64: 64, 32>}, {pipeline_mode = #tpu.pipeline_mode<synchronous>, transform_indices = @transform_5, window_bounds = array<i64: 1, 32>}, {pipeline_mode = #tpu.pipeline_mode<synchronous>, transform_indices = @transform_6, window_bounds = array<i64: 32, 32>}, {pipeline_mode = #tpu.pipeline_mode<synchronous>, transform_indices = @transform_7, window_bounds = array<i64: 1, 32>}, {pipeline_mode = #tpu.pipeline_mode<synchronous>, transform_indices = @transform_8, window_bounds = array<i64: 32, 32>}, {pipeline_mode = #tpu.pipeline_mode<synchronous>, transform_indices = @transform_9, window_bounds = array<i64: 1, 32>}, {pipeline_mode = #tpu.pipeline_mode<synchronous>, transform_indices = @transform_10, window_bounds = array<i64: 32, 32>}, {pipeline_mode = #tpu.pipeline_mode<synchronous>, transform_indices = @transform_11, window_bounds = array<i64: 1, 32>}, {transform_indices = @transform_12, window_bounds = array<i64: 16, 32>}]} {
    %c0 = arith.constant 0 : index
    %c0_0 = arith.constant 0 : index
    %c0_1 = arith.constant 0 : index
    %0 = vector.load %arg1[%c0, %c0_0, %c0_1] : memref<8x16x10xf32, #tpu.memory_space<vmem>>, vector<1x16x10xf32>
    %1 = vector.shape_cast %0 : vector<1x16x10xf32> to vector<16x10xf32>
    %c0_2 = arith.constant 0 : index
    %c0_3 = arith.constant 0 : index
    %c0_4 = arith.constant 0 : index
    %2 = vector.load %arg2[%c0_2, %c0_3, %c0_4] : memref<8x16x1xf32, #tpu.memory_space<vmem>>, vector<1x16x1xf32>
    %3 = vector.shape_cast %2 : vector<1x16x1xf32> to vector<16x1xf32>
    %4 = arith.truncf %1 : vector<16x10xf32> to vector<16x10xbf16>
    %c0_5 = arith.constant 0 : index
    %c0_6 = arith.constant 0 : index
    %5 = vector.load %arg3[%c0_5, %c0_6] : memref<10x32xbf16, #tpu.memory_space<vmem>>, vector<10x32xbf16>
    %cst = arith.constant dense<0.000000e+00> : vector<16x32xf32>
    %6 = tpu.matmul %4, %5, %cst {dimension_numbers = #tpu.dot_dimension_numbers<[1], [0], [0], [1], [0, 0, 1, 1], [], []>} : vector<16x10xbf16>, vector<10x32xbf16>, vector<16x32xf32> -> vector<16x32xf32>
    %c0_7 = arith.constant 0 : index
    %c0_8 = arith.constant 0 : index
    %7 = vector.load %arg4[%c0_7, %c0_8] : memref<1x32xf32, #tpu.memory_space<vmem>>, vector<1x32xf32>
    %8 = vector.broadcast %7 : vector<1x32xf32> to vector<16x32xf32>
    %9 = arith.addf %6, %8 : vector<16x32xf32>
    %cst_9 = arith.constant 0.000000e+00 : f32
    %10 = vector.broadcast %cst_9 : f32 to vector<16x32xf32>
    %11 = arith.maximumf %9, %10 : vector<16x32xf32>
    %12 = vector.broadcast %3 : vector<16x1xf32> to vector<16x32xf32>
    %13 = arith.mulf %11, %12 : vector<16x32xf32>
    %c1 = arith.constant 1 : index
    %c0_10 = arith.constant 0 : index
    %c0_11 = arith.constant 0 : index
    %14 = vector.load %arg1[%c1, %c0_10, %c0_11] : memref<8x16x10xf32, #tpu.memory_space<vmem>>, vector<1x16x10xf32>
    %15 = vector.shape_cast %14 : vector<1x16x10xf32> to vector<16x10xf32>
    %c1_12 = arith.constant 1 : index
    %c0_13 = arith.constant 0 : index
    %c0_14 = arith.constant 0 : index
    %16 = vector.load %arg2[%c1_12, %c0_13, %c0_14] : memref<8x16x1xf32, #tpu.memory_space<vmem>>, vector<1x16x1xf32>
    %17 = vector.shape_cast %16 : vector<1x16x1xf32> to vector<16x1xf32>
    %18 = arith.truncf %15 : vector<16x10xf32> to vector<16x10xbf16>
    %c0_15 = arith.constant 0 : index
    %c0_16 = arith.constant 0 : index
    %19 = vector.load %arg3[%c0_15, %c0_16] : memref<10x32xbf16, #tpu.memory_space<vmem>>, vector<10x32xbf16>
    %cst_17 = arith.constant dense<0.000000e+00> : vector<16x32xf32>
    %20 = tpu.matmul %18, %19, %cst_17 {dimension_numbers = #tpu.dot_dimension_numbers<[1], [0], [0], [1], [0, 0, 1, 1], [], []>} : vector<16x10xbf16>, vector<10x32xbf16>, vector<16x32xf32> -> vector<16x32xf32>
    %c0_18 = arith.constant 0 : index
    %c0_19 = arith.constant 0 : index
    %21 = vector.load %arg4[%c0_18, %c0_19] : memref<1x32xf32, #tpu.memory_space<vmem>>, vector<1x32xf32>
    %22 = vector.broadcast %21 : vector<1x32xf32> to vector<16x32xf32>
    %23 = arith.addf %20, %22 : vector<16x32xf32>
    %cst_20 = arith.constant 0.000000e+00 : f32
    %24 = vector.broadcast %cst_20 : f32 to vector<16x32xf32>
    %25 = arith.maximumf %23, %24 : vector<16x32xf32>
    %26 = vector.broadcast %17 : vector<16x1xf32> to vector<16x32xf32>
    %27 = arith.mulf %25, %26 : vector<16x32xf32>
    %28 = arith.maximumf %13, %27 : vector<16x32xf32>
    %29 = arith.maximumf %3, %17 : vector<16x1xf32>
    %c2 = arith.constant 2 : index
    %c0_21 = arith.constant 0 : index
    %c0_22 = arith.constant 0 : index
    %30 = vector.load %arg1[%c2, %c0_21, %c0_22] : memref<8x16x10xf32, #tpu.memory_space<vmem>>, vector<1x16x10xf32>
    %31 = vector.shape_cast %30 : vector<1x16x10xf32> to vector<16x10xf32>
    %c2_23 = arith.constant 2 : index
    %c0_24 = arith.constant 0 : index
    %c0_25 = arith.constant 0 : index
    %32 = vector.load %arg2[%c2_23, %c0_24, %c0_25] : memref<8x16x1xf32, #tpu.memory_space<vmem>>, vector<1x16x1xf32>
    %33 = vector.shape_cast %32 : vector<1x16x1xf32> to vector<16x1xf32>
    %34 = arith.truncf %31 : vector<16x10xf32> to vector<16x10xbf16>
    %c0_26 = arith.constant 0 : index
    %c0_27 = arith.constant 0 : index
    %35 = vector.load %arg3[%c0_26, %c0_27] : memref<10x32xbf16, #tpu.memory_space<vmem>>, vector<10x32xbf16>
    %cst_28 = arith.constant dense<0.000000e+00> : vector<16x32xf32>
    %36 = tpu.matmul %34, %35, %cst_28 {dimension_numbers = #tpu.dot_dimension_numbers<[1], [0], [0], [1], [0, 0, 1, 1], [], []>} : vector<16x10xbf16>, vector<10x32xbf16>, vector<16x32xf32> -> vector<16x32xf32>
    %c0_29 = arith.constant 0 : index
    %c0_30 = arith.constant 0 : index
    %37 = vector.load %arg4[%c0_29, %c0_30] : memref<1x32xf32, #tpu.memory_space<vmem>>, vector<1x32xf32>
    %38 = vector.broadcast %37 : vector<1x32xf32> to vector<16x32xf32>
    %39 = arith.addf %36, %38 : vector<16x32xf32>
    %cst_31 = arith.constant 0.000000e+00 : f32
    %40 = vector.broadcast %cst_31 : f32 to vector<16x32xf32>
    %41 = arith.maximumf %39, %40 : vector<16x32xf32>
    %42 = vector.broadcast %33 : vector<16x1xf32> to vector<16x32xf32>
    %43 = arith.mulf %41, %42 : vector<16x32xf32>
    %44 = arith.maximumf %28, %43 : vector<16x32xf32>
    %45 = arith.maximumf %29, %33 : vector<16x1xf32>
    %c3 = arith.constant 3 : index
    %c0_32 = arith.constant 0 : index
    %c0_33 = arith.constant 0 : index
    %46 = vector.load %arg1[%c3, %c0_32, %c0_33] : memref<8x16x10xf32, #tpu.memory_space<vmem>>, vector<1x16x10xf32>
    %47 = vector.shape_cast %46 : vector<1x16x10xf32> to vector<16x10xf32>
    %c3_34 = arith.constant 3 : index
    %c0_35 = arith.constant 0 : index
    %c0_36 = arith.constant 0 : index
    %48 = vector.load %arg2[%c3_34, %c0_35, %c0_36] : memref<8x16x1xf32, #tpu.memory_space<vmem>>, vector<1x16x1xf32>
    %49 = vector.shape_cast %48 : vector<1x16x1xf32> to vector<16x1xf32>
    %50 = arith.truncf %47 : vector<16x10xf32> to vector<16x10xbf16>
    %c0_37 = arith.constant 0 : index
    %c0_38 = arith.constant 0 : index
    %51 = vector.load %arg3[%c0_37, %c0_38] : memref<10x32xbf16, #tpu.memory_space<vmem>>, vector<10x32xbf16>
    %cst_39 = arith.constant dense<0.000000e+00> : vector<16x32xf32>
    %52 = tpu.matmul %50, %51, %cst_39 {dimension_numbers = #tpu.dot_dimension_numbers<[1], [0], [0], [1], [0, 0, 1, 1], [], []>} : vector<16x10xbf16>, vector<10x32xbf16>, vector<16x32xf32> -> vector<16x32xf32>
    %c0_40 = arith.constant 0 : index
    %c0_41 = arith.constant 0 : index
    %53 = vector.load %arg4[%c0_40, %c0_41] : memref<1x32xf32, #tpu.memory_space<vmem>>, vector<1x32xf32>
    %54 = vector.broadcast %53 : vector<1x32xf32> to vector<16x32xf32>
    %55 = arith.addf %52, %54 : vector<16x32xf32>
    %cst_42 = arith.constant 0.000000e+00 : f32
    %56 = vector.broadcast %cst_42 : f32 to vector<16x32xf32>
    %57 = arith.maximumf %55, %56 : vector<16x32xf32>
    %58 = vector.broadcast %49 : vector<16x1xf32> to vector<16x32xf32>
    %59 = arith.mulf %57, %58 : vector<16x32xf32>
    %60 = arith.maximumf %44, %59 : vector<16x32xf32>
    %61 = arith.maximumf %45, %49 : vector<16x1xf32>
    %c4 = arith.constant 4 : index
    %c0_43 = arith.constant 0 : index
    %c0_44 = arith.constant 0 : index
    %62 = vector.load %arg1[%c4, %c0_43, %c0_44] : memref<8x16x10xf32, #tpu.memory_space<vmem>>, vector<1x16x10xf32>
    %63 = vector.shape_cast %62 : vector<1x16x10xf32> to vector<16x10xf32>
    %c4_45 = arith.constant 4 : index
    %c0_46 = arith.constant 0 : index
    %c0_47 = arith.constant 0 : index
    %64 = vector.load %arg2[%c4_45, %c0_46, %c0_47] : memref<8x16x1xf32, #tpu.memory_space<vmem>>, vector<1x16x1xf32>
    %65 = vector.shape_cast %64 : vector<1x16x1xf32> to vector<16x1xf32>
    %66 = arith.truncf %63 : vector<16x10xf32> to vector<16x10xbf16>
    %c0_48 = arith.constant 0 : index
    %c0_49 = arith.constant 0 : index
    %67 = vector.load %arg3[%c0_48, %c0_49] : memref<10x32xbf16, #tpu.memory_space<vmem>>, vector<10x32xbf16>
    %cst_50 = arith.constant dense<0.000000e+00> : vector<16x32xf32>
    %68 = tpu.matmul %66, %67, %cst_50 {dimension_numbers = #tpu.dot_dimension_numbers<[1], [0], [0], [1], [0, 0, 1, 1], [], []>} : vector<16x10xbf16>, vector<10x32xbf16>, vector<16x32xf32> -> vector<16x32xf32>
    %c0_51 = arith.constant 0 : index
    %c0_52 = arith.constant 0 : index
    %69 = vector.load %arg4[%c0_51, %c0_52] : memref<1x32xf32, #tpu.memory_space<vmem>>, vector<1x32xf32>
    %70 = vector.broadcast %69 : vector<1x32xf32> to vector<16x32xf32>
    %71 = arith.addf %68, %70 : vector<16x32xf32>
    %cst_53 = arith.constant 0.000000e+00 : f32
    %72 = vector.broadcast %cst_53 : f32 to vector<16x32xf32>
    %73 = arith.maximumf %71, %72 : vector<16x32xf32>
    %74 = vector.broadcast %65 : vector<16x1xf32> to vector<16x32xf32>
    %75 = arith.mulf %73, %74 : vector<16x32xf32>
    %76 = arith.maximumf %60, %75 : vector<16x32xf32>
    %77 = arith.maximumf %61, %65 : vector<16x1xf32>
    %c5 = arith.constant 5 : index
    %c0_54 = arith.constant 0 : index
    %c0_55 = arith.constant 0 : index
    %78 = vector.load %arg1[%c5, %c0_54, %c0_55] : memref<8x16x10xf32, #tpu.memory_space<vmem>>, vector<1x16x10xf32>
    %79 = vector.shape_cast %78 : vector<1x16x10xf32> to vector<16x10xf32>
    %c5_56 = arith.constant 5 : index
    %c0_57 = arith.constant 0 : index
    %c0_58 = arith.constant 0 : index
    %80 = vector.load %arg2[%c5_56, %c0_57, %c0_58] : memref<8x16x1xf32, #tpu.memory_space<vmem>>, vector<1x16x1xf32>
    %81 = vector.shape_cast %80 : vector<1x16x1xf32> to vector<16x1xf32>
    %82 = arith.truncf %79 : vector<16x10xf32> to vector<16x10xbf16>
    %c0_59 = arith.constant 0 : index
    %c0_60 = arith.constant 0 : index
    %83 = vector.load %arg3[%c0_59, %c0_60] : memref<10x32xbf16, #tpu.memory_space<vmem>>, vector<10x32xbf16>
    %cst_61 = arith.constant dense<0.000000e+00> : vector<16x32xf32>
    %84 = tpu.matmul %82, %83, %cst_61 {dimension_numbers = #tpu.dot_dimension_numbers<[1], [0], [0], [1], [0, 0, 1, 1], [], []>} : vector<16x10xbf16>, vector<10x32xbf16>, vector<16x32xf32> -> vector<16x32xf32>
    %c0_62 = arith.constant 0 : index
    %c0_63 = arith.constant 0 : index
    %85 = vector.load %arg4[%c0_62, %c0_63] : memref<1x32xf32, #tpu.memory_space<vmem>>, vector<1x32xf32>
    %86 = vector.broadcast %85 : vector<1x32xf32> to vector<16x32xf32>
    %87 = arith.addf %84, %86 : vector<16x32xf32>
    %cst_64 = arith.constant 0.000000e+00 : f32
    %88 = vector.broadcast %cst_64 : f32 to vector<16x32xf32>
    %89 = arith.maximumf %87, %88 : vector<16x32xf32>
    %90 = vector.broadcast %81 : vector<16x1xf32> to vector<16x32xf32>
    %91 = arith.mulf %89, %90 : vector<16x32xf32>
    %92 = arith.maximumf %76, %91 : vector<16x32xf32>
    %93 = arith.maximumf %77, %81 : vector<16x1xf32>
    %c6 = arith.constant 6 : index
    %c0_65 = arith.constant 0 : index
    %c0_66 = arith.constant 0 : index
    %94 = vector.load %arg1[%c6, %c0_65, %c0_66] : memref<8x16x10xf32, #tpu.memory_space<vmem>>, vector<1x16x10xf32>
    %95 = vector.shape_cast %94 : vector<1x16x10xf32> to vector<16x10xf32>
    %c6_67 = arith.constant 6 : index
    %c0_68 = arith.constant 0 : index
    %c0_69 = arith.constant 0 : index
    %96 = vector.load %arg2[%c6_67, %c0_68, %c0_69] : memref<8x16x1xf32, #tpu.memory_space<vmem>>, vector<1x16x1xf32>
    %97 = vector.shape_cast %96 : vector<1x16x1xf32> to vector<16x1xf32>
    %98 = arith.truncf %95 : vector<16x10xf32> to vector<16x10xbf16>
    %c0_70 = arith.constant 0 : index
    %c0_71 = arith.constant 0 : index
    %99 = vector.load %arg3[%c0_70, %c0_71] : memref<10x32xbf16, #tpu.memory_space<vmem>>, vector<10x32xbf16>
    %cst_72 = arith.constant dense<0.000000e+00> : vector<16x32xf32>
    %100 = tpu.matmul %98, %99, %cst_72 {dimension_numbers = #tpu.dot_dimension_numbers<[1], [0], [0], [1], [0, 0, 1, 1], [], []>} : vector<16x10xbf16>, vector<10x32xbf16>, vector<16x32xf32> -> vector<16x32xf32>
    %c0_73 = arith.constant 0 : index
    %c0_74 = arith.constant 0 : index
    %101 = vector.load %arg4[%c0_73, %c0_74] : memref<1x32xf32, #tpu.memory_space<vmem>>, vector<1x32xf32>
    %102 = vector.broadcast %101 : vector<1x32xf32> to vector<16x32xf32>
    %103 = arith.addf %100, %102 : vector<16x32xf32>
    %cst_75 = arith.constant 0.000000e+00 : f32
    %104 = vector.broadcast %cst_75 : f32 to vector<16x32xf32>
    %105 = arith.maximumf %103, %104 : vector<16x32xf32>
    %106 = vector.broadcast %97 : vector<16x1xf32> to vector<16x32xf32>
    %107 = arith.mulf %105, %106 : vector<16x32xf32>
    %108 = arith.maximumf %92, %107 : vector<16x32xf32>
    %109 = arith.maximumf %93, %97 : vector<16x1xf32>
    %c7 = arith.constant 7 : index
    %c0_76 = arith.constant 0 : index
    %c0_77 = arith.constant 0 : index
    %110 = vector.load %arg1[%c7, %c0_76, %c0_77] : memref<8x16x10xf32, #tpu.memory_space<vmem>>, vector<1x16x10xf32>
    %111 = vector.shape_cast %110 : vector<1x16x10xf32> to vector<16x10xf32>
    %c7_78 = arith.constant 7 : index
    %c0_79 = arith.constant 0 : index
    %c0_80 = arith.constant 0 : index
    %112 = vector.load %arg2[%c7_78, %c0_79, %c0_80] : memref<8x16x1xf32, #tpu.memory_space<vmem>>, vector<1x16x1xf32>
    %113 = vector.shape_cast %112 : vector<1x16x1xf32> to vector<16x1xf32>
    %114 = arith.truncf %111 : vector<16x10xf32> to vector<16x10xbf16>
    %c0_81 = arith.constant 0 : index
    %c0_82 = arith.constant 0 : index
    %115 = vector.load %arg3[%c0_81, %c0_82] : memref<10x32xbf16, #tpu.memory_space<vmem>>, vector<10x32xbf16>
    %cst_83 = arith.constant dense<0.000000e+00> : vector<16x32xf32>
    %116 = tpu.matmul %114, %115, %cst_83 {dimension_numbers = #tpu.dot_dimension_numbers<[1], [0], [0], [1], [0, 0, 1, 1], [], []>} : vector<16x10xbf16>, vector<10x32xbf16>, vector<16x32xf32> -> vector<16x32xf32>
    %c0_84 = arith.constant 0 : index
    %c0_85 = arith.constant 0 : index
    %117 = vector.load %arg4[%c0_84, %c0_85] : memref<1x32xf32, #tpu.memory_space<vmem>>, vector<1x32xf32>
    %118 = vector.broadcast %117 : vector<1x32xf32> to vector<16x32xf32>
    %119 = arith.addf %116, %118 : vector<16x32xf32>
    %cst_86 = arith.constant 0.000000e+00 : f32
    %120 = vector.broadcast %cst_86 : f32 to vector<16x32xf32>
    %121 = arith.maximumf %119, %120 : vector<16x32xf32>
    %122 = vector.broadcast %113 : vector<16x1xf32> to vector<16x32xf32>
    %123 = arith.mulf %121, %122 : vector<16x32xf32>
    %124 = arith.maximumf %108, %123 : vector<16x32xf32>
    %125 = arith.maximumf %109, %113 : vector<16x1xf32>
    %126 = tpu.concatenate %13, %124 in 1 : vector<16x32xf32>, vector<16x32xf32> -> vector<16x64xf32>
    %127 = arith.truncf %126 : vector<16x64xf32> to vector<16x64xbf16>
    %c0_87 = arith.constant 0 : index
    %c0_88 = arith.constant 0 : index
    %128 = vector.load %arg5[%c0_87, %c0_88] : memref<64x32xbf16, #tpu.memory_space<vmem>>, vector<64x32xbf16>
    %cst_89 = arith.constant dense<0.000000e+00> : vector<16x32xf32>
    %129 = tpu.matmul %127, %128, %cst_89 {dimension_numbers = #tpu.dot_dimension_numbers<[1], [0], [0], [1], [0, 0, 1, 1], [], []>} : vector<16x64xbf16>, vector<64x32xbf16>, vector<16x32xf32> -> vector<16x32xf32>
    %c0_90 = arith.constant 0 : index
    %c0_91 = arith.constant 0 : index
    %130 = vector.load %arg6[%c0_90, %c0_91] : memref<1x32xf32, #tpu.memory_space<vmem>>, vector<1x32xf32>
    %131 = vector.broadcast %130 : vector<1x32xf32> to vector<16x32xf32>
    %132 = arith.addf %129, %131 : vector<16x32xf32>
    %cst_92 = arith.constant 0.000000e+00 : f32
    %133 = vector.broadcast %cst_92 : f32 to vector<16x32xf32>
    %134 = arith.maximumf %132, %133 : vector<16x32xf32>
    %135 = arith.truncf %134 : vector<16x32xf32> to vector<16x32xbf16>
    %c0_93 = arith.constant 0 : index
    %c0_94 = arith.constant 0 : index
    %136 = vector.load %arg7[%c0_93, %c0_94] : memref<32x32xbf16, #tpu.memory_space<vmem>>, vector<32x32xbf16>
    %cst_95 = arith.constant dense<0.000000e+00> : vector<16x32xf32>
    %137 = tpu.matmul %135, %136, %cst_95 {dimension_numbers = #tpu.dot_dimension_numbers<[1], [0], [0], [1], [0, 0, 1, 1], [], []>} : vector<16x32xbf16>, vector<32x32xbf16>, vector<16x32xf32> -> vector<16x32xf32>
    %c0_96 = arith.constant 0 : index
    %c0_97 = arith.constant 0 : index
    %138 = vector.load %arg8[%c0_96, %c0_97] : memref<1x32xf32, #tpu.memory_space<vmem>>, vector<1x32xf32>
    %139 = vector.broadcast %138 : vector<1x32xf32> to vector<16x32xf32>
    %140 = arith.addf %137, %139 : vector<16x32xf32>
    %cst_98 = arith.constant 0.000000e+00 : f32
    %141 = vector.broadcast %cst_98 : f32 to vector<16x32xf32>
    %142 = arith.maximumf %140, %141 : vector<16x32xf32>
    %c0_99 = arith.constant 0 : index
    %c0_100 = arith.constant 0 : index
    %c0_101 = arith.constant 0 : index
    %143 = vector.load %arg2[%c0_99, %c0_100, %c0_101] : memref<8x16x1xf32, #tpu.memory_space<vmem>>, vector<1x16x1xf32>
    %144 = vector.shape_cast %143 : vector<1x16x1xf32> to vector<16x1xf32>
    %145 = vector.broadcast %144 : vector<16x1xf32> to vector<16x32xf32>
    %146 = arith.mulf %142, %145 : vector<16x32xf32>
    %147 = tpu.concatenate %27, %124 in 1 : vector<16x32xf32>, vector<16x32xf32> -> vector<16x64xf32>
    %148 = arith.truncf %147 : vector<16x64xf32> to vector<16x64xbf16>
    %c0_102 = arith.constant 0 : index
    %c0_103 = arith.constant 0 : index
    %149 = vector.load %arg5[%c0_102, %c0_103] : memref<64x32xbf16, #tpu.memory_space<vmem>>, vector<64x32xbf16>
    %cst_104 = arith.constant dense<0.000000e+00> : vector<16x32xf32>
    %150 = tpu.matmul %148, %149, %cst_104 {dimension_numbers = #tpu.dot_dimension_numbers<[1], [0], [0], [1], [0, 0, 1, 1], [], []>} : vector<16x64xbf16>, vector<64x32xbf16>, vector<16x32xf32> -> vector<16x32xf32>
    %c0_105 = arith.constant 0 : index
    %c0_106 = arith.constant 0 : index
    %151 = vector.load %arg6[%c0_105, %c0_106] : memref<1x32xf32, #tpu.memory_space<vmem>>, vector<1x32xf32>
    %152 = vector.broadcast %151 : vector<1x32xf32> to vector<16x32xf32>
    %153 = arith.addf %150, %152 : vector<16x32xf32>
    %cst_107 = arith.constant 0.000000e+00 : f32
    %154 = vector.broadcast %cst_107 : f32 to vector<16x32xf32>
    %155 = arith.maximumf %153, %154 : vector<16x32xf32>
    %156 = arith.truncf %155 : vector<16x32xf32> to vector<16x32xbf16>
    %c0_108 = arith.constant 0 : index
    %c0_109 = arith.constant 0 : index
    %157 = vector.load %arg7[%c0_108, %c0_109] : memref<32x32xbf16, #tpu.memory_space<vmem>>, vector<32x32xbf16>
    %cst_110 = arith.constant dense<0.000000e+00> : vector<16x32xf32>
    %158 = tpu.matmul %156, %157, %cst_110 {dimension_numbers = #tpu.dot_dimension_numbers<[1], [0], [0], [1], [0, 0, 1, 1], [], []>} : vector<16x32xbf16>, vector<32x32xbf16>, vector<16x32xf32> -> vector<16x32xf32>
    %c0_111 = arith.constant 0 : index
    %c0_112 = arith.constant 0 : index
    %159 = vector.load %arg8[%c0_111, %c0_112] : memref<1x32xf32, #tpu.memory_space<vmem>>, vector<1x32xf32>
    %160 = vector.broadcast %159 : vector<1x32xf32> to vector<16x32xf32>
    %161 = arith.addf %158, %160 : vector<16x32xf32>
    %cst_113 = arith.constant 0.000000e+00 : f32
    %162 = vector.broadcast %cst_113 : f32 to vector<16x32xf32>
    %163 = arith.maximumf %161, %162 : vector<16x32xf32>
    %c1_114 = arith.constant 1 : index
    %c0_115 = arith.constant 0 : index
    %c0_116 = arith.constant 0 : index
    %164 = vector.load %arg2[%c1_114, %c0_115, %c0_116] : memref<8x16x1xf32, #tpu.memory_space<vmem>>, vector<1x16x1xf32>
    %165 = vector.shape_cast %164 : vector<1x16x1xf32> to vector<16x1xf32>
    %166 = vector.broadcast %165 : vector<16x1xf32> to vector<16x32xf32>
    %167 = arith.mulf %163, %166 : vector<16x32xf32>
    %168 = arith.maximumf %146, %167 : vector<16x32xf32>
    %169 = tpu.concatenate %43, %124 in 1 : vector<16x32xf32>, vector<16x32xf32> -> vector<16x64xf32>
    %170 = arith.truncf %169 : vector<16x64xf32> to vector<16x64xbf16>
    %c0_117 = arith.constant 0 : index
    %c0_118 = arith.constant 0 : index
    %171 = vector.load %arg5[%c0_117, %c0_118] : memref<64x32xbf16, #tpu.memory_space<vmem>>, vector<64x32xbf16>
    %cst_119 = arith.constant dense<0.000000e+00> : vector<16x32xf32>
    %172 = tpu.matmul %170, %171, %cst_119 {dimension_numbers = #tpu.dot_dimension_numbers<[1], [0], [0], [1], [0, 0, 1, 1], [], []>} : vector<16x64xbf16>, vector<64x32xbf16>, vector<16x32xf32> -> vector<16x32xf32>
    %c0_120 = arith.constant 0 : index
    %c0_121 = arith.constant 0 : index
    %173 = vector.load %arg6[%c0_120, %c0_121] : memref<1x32xf32, #tpu.memory_space<vmem>>, vector<1x32xf32>
    %174 = vector.broadcast %173 : vector<1x32xf32> to vector<16x32xf32>
    %175 = arith.addf %172, %174 : vector<16x32xf32>
    %cst_122 = arith.constant 0.000000e+00 : f32
    %176 = vector.broadcast %cst_122 : f32 to vector<16x32xf32>
    %177 = arith.maximumf %175, %176 : vector<16x32xf32>
    %178 = arith.truncf %177 : vector<16x32xf32> to vector<16x32xbf16>
    %c0_123 = arith.constant 0 : index
    %c0_124 = arith.constant 0 : index
    %179 = vector.load %arg7[%c0_123, %c0_124] : memref<32x32xbf16, #tpu.memory_space<vmem>>, vector<32x32xbf16>
    %cst_125 = arith.constant dense<0.000000e+00> : vector<16x32xf32>
    %180 = tpu.matmul %178, %179, %cst_125 {dimension_numbers = #tpu.dot_dimension_numbers<[1], [0], [0], [1], [0, 0, 1, 1], [], []>} : vector<16x32xbf16>, vector<32x32xbf16>, vector<16x32xf32> -> vector<16x32xf32>
    %c0_126 = arith.constant 0 : index
    %c0_127 = arith.constant 0 : index
    %181 = vector.load %arg8[%c0_126, %c0_127] : memref<1x32xf32, #tpu.memory_space<vmem>>, vector<1x32xf32>
    %182 = vector.broadcast %181 : vector<1x32xf32> to vector<16x32xf32>
    %183 = arith.addf %180, %182 : vector<16x32xf32>
    %cst_128 = arith.constant 0.000000e+00 : f32
    %184 = vector.broadcast %cst_128 : f32 to vector<16x32xf32>
    %185 = arith.maximumf %183, %184 : vector<16x32xf32>
    %c2_129 = arith.constant 2 : index
    %c0_130 = arith.constant 0 : index
    %c0_131 = arith.constant 0 : index
    %186 = vector.load %arg2[%c2_129, %c0_130, %c0_131] : memref<8x16x1xf32, #tpu.memory_space<vmem>>, vector<1x16x1xf32>
    %187 = vector.shape_cast %186 : vector<1x16x1xf32> to vector<16x1xf32>
    %188 = vector.broadcast %187 : vector<16x1xf32> to vector<16x32xf32>
    %189 = arith.mulf %185, %188 : vector<16x32xf32>
    %190 = arith.maximumf %168, %189 : vector<16x32xf32>
    %191 = tpu.concatenate %59, %124 in 1 : vector<16x32xf32>, vector<16x32xf32> -> vector<16x64xf32>
    %192 = arith.truncf %191 : vector<16x64xf32> to vector<16x64xbf16>
    %c0_132 = arith.constant 0 : index
    %c0_133 = arith.constant 0 : index
    %193 = vector.load %arg5[%c0_132, %c0_133] : memref<64x32xbf16, #tpu.memory_space<vmem>>, vector<64x32xbf16>
    %cst_134 = arith.constant dense<0.000000e+00> : vector<16x32xf32>
    %194 = tpu.matmul %192, %193, %cst_134 {dimension_numbers = #tpu.dot_dimension_numbers<[1], [0], [0], [1], [0, 0, 1, 1], [], []>} : vector<16x64xbf16>, vector<64x32xbf16>, vector<16x32xf32> -> vector<16x32xf32>
    %c0_135 = arith.constant 0 : index
    %c0_136 = arith.constant 0 : index
    %195 = vector.load %arg6[%c0_135, %c0_136] : memref<1x32xf32, #tpu.memory_space<vmem>>, vector<1x32xf32>
    %196 = vector.broadcast %195 : vector<1x32xf32> to vector<16x32xf32>
    %197 = arith.addf %194, %196 : vector<16x32xf32>
    %cst_137 = arith.constant 0.000000e+00 : f32
    %198 = vector.broadcast %cst_137 : f32 to vector<16x32xf32>
    %199 = arith.maximumf %197, %198 : vector<16x32xf32>
    %200 = arith.truncf %199 : vector<16x32xf32> to vector<16x32xbf16>
    %c0_138 = arith.constant 0 : index
    %c0_139 = arith.constant 0 : index
    %201 = vector.load %arg7[%c0_138, %c0_139] : memref<32x32xbf16, #tpu.memory_space<vmem>>, vector<32x32xbf16>
    %cst_140 = arith.constant dense<0.000000e+00> : vector<16x32xf32>
    %202 = tpu.matmul %200, %201, %cst_140 {dimension_numbers = #tpu.dot_dimension_numbers<[1], [0], [0], [1], [0, 0, 1, 1], [], []>} : vector<16x32xbf16>, vector<32x32xbf16>, vector<16x32xf32> -> vector<16x32xf32>
    %c0_141 = arith.constant 0 : index
    %c0_142 = arith.constant 0 : index
    %203 = vector.load %arg8[%c0_141, %c0_142] : memref<1x32xf32, #tpu.memory_space<vmem>>, vector<1x32xf32>
    %204 = vector.broadcast %203 : vector<1x32xf32> to vector<16x32xf32>
    %205 = arith.addf %202, %204 : vector<16x32xf32>
    %cst_143 = arith.constant 0.000000e+00 : f32
    %206 = vector.broadcast %cst_143 : f32 to vector<16x32xf32>
    %207 = arith.maximumf %205, %206 : vector<16x32xf32>
    %c3_144 = arith.constant 3 : index
    %c0_145 = arith.constant 0 : index
    %c0_146 = arith.constant 0 : index
    %208 = vector.load %arg2[%c3_144, %c0_145, %c0_146] : memref<8x16x1xf32, #tpu.memory_space<vmem>>, vector<1x16x1xf32>
    %209 = vector.shape_cast %208 : vector<1x16x1xf32> to vector<16x1xf32>
    %210 = vector.broadcast %209 : vector<16x1xf32> to vector<16x32xf32>
    %211 = arith.mulf %207, %210 : vector<16x32xf32>
    %212 = arith.maximumf %190, %211 : vector<16x32xf32>
    %213 = tpu.concatenate %75, %124 in 1 : vector<16x32xf32>, vector<16x32xf32> -> vector<16x64xf32>
    %214 = arith.truncf %213 : vector<16x64xf32> to vector<16x64xbf16>
    %c0_147 = arith.constant 0 : index
    %c0_148 = arith.constant 0 : index
    %215 = vector.load %arg5[%c0_147, %c0_148] : memref<64x32xbf16, #tpu.memory_space<vmem>>, vector<64x32xbf16>
    %cst_149 = arith.constant dense<0.000000e+00> : vector<16x32xf32>
    %216 = tpu.matmul %214, %215, %cst_149 {dimension_numbers = #tpu.dot_dimension_numbers<[1], [0], [0], [1], [0, 0, 1, 1], [], []>} : vector<16x64xbf16>, vector<64x32xbf16>, vector<16x32xf32> -> vector<16x32xf32>
    %c0_150 = arith.constant 0 : index
    %c0_151 = arith.constant 0 : index
    %217 = vector.load %arg6[%c0_150, %c0_151] : memref<1x32xf32, #tpu.memory_space<vmem>>, vector<1x32xf32>
    %218 = vector.broadcast %217 : vector<1x32xf32> to vector<16x32xf32>
    %219 = arith.addf %216, %218 : vector<16x32xf32>
    %cst_152 = arith.constant 0.000000e+00 : f32
    %220 = vector.broadcast %cst_152 : f32 to vector<16x32xf32>
    %221 = arith.maximumf %219, %220 : vector<16x32xf32>
    %222 = arith.truncf %221 : vector<16x32xf32> to vector<16x32xbf16>
    %c0_153 = arith.constant 0 : index
    %c0_154 = arith.constant 0 : index
    %223 = vector.load %arg7[%c0_153, %c0_154] : memref<32x32xbf16, #tpu.memory_space<vmem>>, vector<32x32xbf16>
    %cst_155 = arith.constant dense<0.000000e+00> : vector<16x32xf32>
    %224 = tpu.matmul %222, %223, %cst_155 {dimension_numbers = #tpu.dot_dimension_numbers<[1], [0], [0], [1], [0, 0, 1, 1], [], []>} : vector<16x32xbf16>, vector<32x32xbf16>, vector<16x32xf32> -> vector<16x32xf32>
    %c0_156 = arith.constant 0 : index
    %c0_157 = arith.constant 0 : index
    %225 = vector.load %arg8[%c0_156, %c0_157] : memref<1x32xf32, #tpu.memory_space<vmem>>, vector<1x32xf32>
    %226 = vector.broadcast %225 : vector<1x32xf32> to vector<16x32xf32>
    %227 = arith.addf %224, %226 : vector<16x32xf32>
    %cst_158 = arith.constant 0.000000e+00 : f32
    %228 = vector.broadcast %cst_158 : f32 to vector<16x32xf32>
    %229 = arith.maximumf %227, %228 : vector<16x32xf32>
    %c4_159 = arith.constant 4 : index
    %c0_160 = arith.constant 0 : index
    %c0_161 = arith.constant 0 : index
    %230 = vector.load %arg2[%c4_159, %c0_160, %c0_161] : memref<8x16x1xf32, #tpu.memory_space<vmem>>, vector<1x16x1xf32>
    %231 = vector.shape_cast %230 : vector<1x16x1xf32> to vector<16x1xf32>
    %232 = vector.broadcast %231 : vector<16x1xf32> to vector<16x32xf32>
    %233 = arith.mulf %229, %232 : vector<16x32xf32>
    %234 = arith.maximumf %212, %233 : vector<16x32xf32>
    %235 = tpu.concatenate %91, %124 in 1 : vector<16x32xf32>, vector<16x32xf32> -> vector<16x64xf32>
    %236 = arith.truncf %235 : vector<16x64xf32> to vector<16x64xbf16>
    %c0_162 = arith.constant 0 : index
    %c0_163 = arith.constant 0 : index
    %237 = vector.load %arg5[%c0_162, %c0_163] : memref<64x32xbf16, #tpu.memory_space<vmem>>, vector<64x32xbf16>
    %cst_164 = arith.constant dense<0.000000e+00> : vector<16x32xf32>
    %238 = tpu.matmul %236, %237, %cst_164 {dimension_numbers = #tpu.dot_dimension_numbers<[1], [0], [0], [1], [0, 0, 1, 1], [], []>} : vector<16x64xbf16>, vector<64x32xbf16>, vector<16x32xf32> -> vector<16x32xf32>
    %c0_165 = arith.constant 0 : index
    %c0_166 = arith.constant 0 : index
    %239 = vector.load %arg6[%c0_165, %c0_166] : memref<1x32xf32, #tpu.memory_space<vmem>>, vector<1x32xf32>
    %240 = vector.broadcast %239 : vector<1x32xf32> to vector<16x32xf32>
    %241 = arith.addf %238, %240 : vector<16x32xf32>
    %cst_167 = arith.constant 0.000000e+00 : f32
    %242 = vector.broadcast %cst_167 : f32 to vector<16x32xf32>
    %243 = arith.maximumf %241, %242 : vector<16x32xf32>
    %244 = arith.truncf %243 : vector<16x32xf32> to vector<16x32xbf16>
    %c0_168 = arith.constant 0 : index
    %c0_169 = arith.constant 0 : index
    %245 = vector.load %arg7[%c0_168, %c0_169] : memref<32x32xbf16, #tpu.memory_space<vmem>>, vector<32x32xbf16>
    %cst_170 = arith.constant dense<0.000000e+00> : vector<16x32xf32>
    %246 = tpu.matmul %244, %245, %cst_170 {dimension_numbers = #tpu.dot_dimension_numbers<[1], [0], [0], [1], [0, 0, 1, 1], [], []>} : vector<16x32xbf16>, vector<32x32xbf16>, vector<16x32xf32> -> vector<16x32xf32>
    %c0_171 = arith.constant 0 : index
    %c0_172 = arith.constant 0 : index
    %247 = vector.load %arg8[%c0_171, %c0_172] : memref<1x32xf32, #tpu.memory_space<vmem>>, vector<1x32xf32>
    %248 = vector.broadcast %247 : vector<1x32xf32> to vector<16x32xf32>
    %249 = arith.addf %246, %248 : vector<16x32xf32>
    %cst_173 = arith.constant 0.000000e+00 : f32
    %250 = vector.broadcast %cst_173 : f32 to vector<16x32xf32>
    %251 = arith.maximumf %249, %250 : vector<16x32xf32>
    %c5_174 = arith.constant 5 : index
    %c0_175 = arith.constant 0 : index
    %c0_176 = arith.constant 0 : index
    %252 = vector.load %arg2[%c5_174, %c0_175, %c0_176] : memref<8x16x1xf32, #tpu.memory_space<vmem>>, vector<1x16x1xf32>
    %253 = vector.shape_cast %252 : vector<1x16x1xf32> to vector<16x1xf32>
    %254 = vector.broadcast %253 : vector<16x1xf32> to vector<16x32xf32>
    %255 = arith.mulf %251, %254 : vector<16x32xf32>
    %256 = arith.maximumf %234, %255 : vector<16x32xf32>
    %257 = tpu.concatenate %107, %124 in 1 : vector<16x32xf32>, vector<16x32xf32> -> vector<16x64xf32>
    %258 = arith.truncf %257 : vector<16x64xf32> to vector<16x64xbf16>
    %c0_177 = arith.constant 0 : index
    %c0_178 = arith.constant 0 : index
    %259 = vector.load %arg5[%c0_177, %c0_178] : memref<64x32xbf16, #tpu.memory_space<vmem>>, vector<64x32xbf16>
    %cst_179 = arith.constant dense<0.000000e+00> : vector<16x32xf32>
    %260 = tpu.matmul %258, %259, %cst_179 {dimension_numbers = #tpu.dot_dimension_numbers<[1], [0], [0], [1], [0, 0, 1, 1], [], []>} : vector<16x64xbf16>, vector<64x32xbf16>, vector<16x32xf32> -> vector<16x32xf32>
    %c0_180 = arith.constant 0 : index
    %c0_181 = arith.constant 0 : index
    %261 = vector.load %arg6[%c0_180, %c0_181] : memref<1x32xf32, #tpu.memory_space<vmem>>, vector<1x32xf32>
    %262 = vector.broadcast %261 : vector<1x32xf32> to vector<16x32xf32>
    %263 = arith.addf %260, %262 : vector<16x32xf32>
    %cst_182 = arith.constant 0.000000e+00 : f32
    %264 = vector.broadcast %cst_182 : f32 to vector<16x32xf32>
    %265 = arith.maximumf %263, %264 : vector<16x32xf32>
    %266 = arith.truncf %265 : vector<16x32xf32> to vector<16x32xbf16>
    %c0_183 = arith.constant 0 : index
    %c0_184 = arith.constant 0 : index
    %267 = vector.load %arg7[%c0_183, %c0_184] : memref<32x32xbf16, #tpu.memory_space<vmem>>, vector<32x32xbf16>
    %cst_185 = arith.constant dense<0.000000e+00> : vector<16x32xf32>
    %268 = tpu.matmul %266, %267, %cst_185 {dimension_numbers = #tpu.dot_dimension_numbers<[1], [0], [0], [1], [0, 0, 1, 1], [], []>} : vector<16x32xbf16>, vector<32x32xbf16>, vector<16x32xf32> -> vector<16x32xf32>
    %c0_186 = arith.constant 0 : index
    %c0_187 = arith.constant 0 : index
    %269 = vector.load %arg8[%c0_186, %c0_187] : memref<1x32xf32, #tpu.memory_space<vmem>>, vector<1x32xf32>
    %270 = vector.broadcast %269 : vector<1x32xf32> to vector<16x32xf32>
    %271 = arith.addf %268, %270 : vector<16x32xf32>
    %cst_188 = arith.constant 0.000000e+00 : f32
    %272 = vector.broadcast %cst_188 : f32 to vector<16x32xf32>
    %273 = arith.maximumf %271, %272 : vector<16x32xf32>
    %c6_189 = arith.constant 6 : index
    %c0_190 = arith.constant 0 : index
    %c0_191 = arith.constant 0 : index
    %274 = vector.load %arg2[%c6_189, %c0_190, %c0_191] : memref<8x16x1xf32, #tpu.memory_space<vmem>>, vector<1x16x1xf32>
    %275 = vector.shape_cast %274 : vector<1x16x1xf32> to vector<16x1xf32>
    %276 = vector.broadcast %275 : vector<16x1xf32> to vector<16x32xf32>
    %277 = arith.mulf %273, %276 : vector<16x32xf32>
    %278 = arith.maximumf %256, %277 : vector<16x32xf32>
    %279 = tpu.concatenate %123, %124 in 1 : vector<16x32xf32>, vector<16x32xf32> -> vector<16x64xf32>
    %280 = arith.truncf %279 : vector<16x64xf32> to vector<16x64xbf16>
    %c0_192 = arith.constant 0 : index
    %c0_193 = arith.constant 0 : index
    %281 = vector.load %arg5[%c0_192, %c0_193] : memref<64x32xbf16, #tpu.memory_space<vmem>>, vector<64x32xbf16>
    %cst_194 = arith.constant dense<0.000000e+00> : vector<16x32xf32>
    %282 = tpu.matmul %280, %281, %cst_194 {dimension_numbers = #tpu.dot_dimension_numbers<[1], [0], [0], [1], [0, 0, 1, 1], [], []>} : vector<16x64xbf16>, vector<64x32xbf16>, vector<16x32xf32> -> vector<16x32xf32>
    %c0_195 = arith.constant 0 : index
    %c0_196 = arith.constant 0 : index
    %283 = vector.load %arg6[%c0_195, %c0_196] : memref<1x32xf32, #tpu.memory_space<vmem>>, vector<1x32xf32>
    %284 = vector.broadcast %283 : vector<1x32xf32> to vector<16x32xf32>
    %285 = arith.addf %282, %284 : vector<16x32xf32>
    %cst_197 = arith.constant 0.000000e+00 : f32
    %286 = vector.broadcast %cst_197 : f32 to vector<16x32xf32>
    %287 = arith.maximumf %285, %286 : vector<16x32xf32>
    %288 = arith.truncf %287 : vector<16x32xf32> to vector<16x32xbf16>
    %c0_198 = arith.constant 0 : index
    %c0_199 = arith.constant 0 : index
    %289 = vector.load %arg7[%c0_198, %c0_199] : memref<32x32xbf16, #tpu.memory_space<vmem>>, vector<32x32xbf16>
    %cst_200 = arith.constant dense<0.000000e+00> : vector<16x32xf32>
    %290 = tpu.matmul %288, %289, %cst_200 {dimension_numbers = #tpu.dot_dimension_numbers<[1], [0], [0], [1], [0, 0, 1, 1], [], []>} : vector<16x32xbf16>, vector<32x32xbf16>, vector<16x32xf32> -> vector<16x32xf32>
    %c0_201 = arith.constant 0 : index
    %c0_202 = arith.constant 0 : index
    %291 = vector.load %arg8[%c0_201, %c0_202] : memref<1x32xf32, #tpu.memory_space<vmem>>, vector<1x32xf32>
    %292 = vector.broadcast %291 : vector<1x32xf32> to vector<16x32xf32>
    %293 = arith.addf %290, %292 : vector<16x32xf32>
    %cst_203 = arith.constant 0.000000e+00 : f32
    %294 = vector.broadcast %cst_203 : f32 to vector<16x32xf32>
    %295 = arith.maximumf %293, %294 : vector<16x32xf32>
    %c7_204 = arith.constant 7 : index
    %c0_205 = arith.constant 0 : index
    %c0_206 = arith.constant 0 : index
    %296 = vector.load %arg2[%c7_204, %c0_205, %c0_206] : memref<8x16x1xf32, #tpu.memory_space<vmem>>, vector<1x16x1xf32>
    %297 = vector.shape_cast %296 : vector<1x16x1xf32> to vector<16x1xf32>
    %298 = vector.broadcast %297 : vector<16x1xf32> to vector<16x32xf32>
    %299 = arith.mulf %295, %298 : vector<16x32xf32>
    %300 = arith.maximumf %278, %299 : vector<16x32xf32>
    %301 = arith.truncf %300 : vector<16x32xf32> to vector<16x32xbf16>
    %c0_207 = arith.constant 0 : index
    %c0_208 = arith.constant 0 : index
    %302 = vector.load %arg9[%c0_207, %c0_208] : memref<32x32xbf16, #tpu.memory_space<vmem>>, vector<32x32xbf16>
    %cst_209 = arith.constant dense<0.000000e+00> : vector<16x32xf32>
    %303 = tpu.matmul %301, %302, %cst_209 {dimension_numbers = #tpu.dot_dimension_numbers<[1], [0], [0], [1], [0, 0, 1, 1], [], []>} : vector<16x32xbf16>, vector<32x32xbf16>, vector<16x32xf32> -> vector<16x32xf32>
    %c0_210 = arith.constant 0 : index
    %c0_211 = arith.constant 0 : index
    %304 = vector.load %arg10[%c0_210, %c0_211] : memref<1x32xf32, #tpu.memory_space<vmem>>, vector<1x32xf32>
    %305 = vector.broadcast %304 : vector<1x32xf32> to vector<16x32xf32>
    %306 = arith.addf %303, %305 : vector<16x32xf32>
    %cst_212 = arith.constant 0.000000e+00 : f32
    %307 = vector.broadcast %cst_212 : f32 to vector<16x32xf32>
    %308 = arith.maximumf %306, %307 : vector<16x32xf32>
    %309 = arith.truncf %308 : vector<16x32xf32> to vector<16x32xbf16>
    %c0_213 = arith.constant 0 : index
    %c0_214 = arith.constant 0 : index
    %310 = vector.load %arg11[%c0_213, %c0_214] : memref<32x32xbf16, #tpu.memory_space<vmem>>, vector<32x32xbf16>
    %cst_215 = arith.constant dense<0.000000e+00> : vector<16x32xf32>
    %311 = tpu.matmul %309, %310, %cst_215 {dimension_numbers = #tpu.dot_dimension_numbers<[1], [0], [0], [1], [0, 0, 1, 1], [], []>} : vector<16x32xbf16>, vector<32x32xbf16>, vector<16x32xf32> -> vector<16x32xf32>
    %c0_216 = arith.constant 0 : index
    %c0_217 = arith.constant 0 : index
    %312 = vector.load %arg12[%c0_216, %c0_217] : memref<1x32xf32, #tpu.memory_space<vmem>>, vector<1x32xf32>
    %313 = vector.broadcast %312 : vector<1x32xf32> to vector<16x32xf32>
    %314 = arith.addf %311, %313 : vector<16x32xf32>
    %315 = vector.broadcast %125 : vector<16x1xf32> to vector<16x32xf32>
    %316 = arith.mulf %314, %315 : vector<16x32xf32>
    %c0_218 = arith.constant 0 : index
    %c0_219 = arith.constant 0 : index
    %317 = vector.load %arg13[%c0_218, %c0_219] : memref<16x32xf32, #tpu.memory_space<vmem>>, vector<16x32xf32>
    tpu.vector_store %arg13[%c0_218, %c0_219], %316 {strides = array<i32>} : memref<16x32xf32, #tpu.memory_space<vmem>>, vector<16x32xf32>,
    return
  }
  func.func @transform_0(%arg0: i32) -> (i32, i32, i32) {
    %c0_i32 = arith.constant 0 : i32
    %c0_i32_0 = arith.constant 0 : i32
    %c0_i32_1 = arith.constant 0 : i32
    return %c0_i32, %arg0, %c0_i32_0 : i32, i32, i32
  }
  func.func @transform_1(%arg0: i32) -> (i32, i32, i32) {
    %c0_i32 = arith.constant 0 : i32
    %c0_i32_0 = arith.constant 0 : i32
    %c0_i32_1 = arith.constant 0 : i32
    return %c0_i32, %arg0, %c0_i32_0 : i32, i32, i32
  }
  func.func @transform_2(%arg0: i32) -> (i32, i32) {
    %c0_i32 = arith.constant 0 : i32
    %c0_i32_0 = arith.constant 0 : i32
    %c0_i32_1 = arith.constant 0 : i32
    return %c0_i32, %c0_i32_0 : i32, i32
  }
  func.func @transform_3(%arg0: i32) -> (i32, i32) {
    %c0_i32 = arith.constant 0 : i32
    %c0_i32_0 = arith.constant 0 : i32
    %c0_i32_1 = arith.constant 0 : i32
    return %c0_i32, %c0_i32_0 : i32, i32
  }
  func.func @transform_4(%arg0: i32) -> (i32, i32) {
    %c0_i32 = arith.constant 0 : i32
    %c0_i32_0 = arith.constant 0 : i32
    %c0_i32_1 = arith.constant 0 : i32
    return %c0_i32, %c0_i32_0 : i32, i32
  }
  func.func @transform_5(%arg0: i32) -> (i32, i32) {
    %c0_i32 = arith.constant 0 : i32
    %c0_i32_0 = arith.constant 0 : i32
    %c0_i32_1 = arith.constant 0 : i32
    return %c0_i32, %c0_i32_0 : i32, i32
  }
  func.func @transform_6(%arg0: i32) -> (i32, i32) {
    %c0_i32 = arith.constant 0 : i32
    %c0_i32_0 = arith.constant 0 : i32
    %c0_i32_1 = arith.constant 0 : i32
    return %c0_i32, %c0_i32_0 : i32, i32
  }
  func.func @transform_7(%arg0: i32) -> (i32, i32) {
    %c0_i32 = arith.constant 0 : i32
    %c0_i32_0 = arith.constant 0 : i32
    %c0_i32_1 = arith.constant 0 : i32
    return %c0_i32, %c0_i32_0 : i32, i32
  }
  func.func @transform_8(%arg0: i32) -> (i32, i32) {
    %c0_i32 = arith.constant 0 : i32
    %c0_i32_0 = arith.constant 0 : i32
    %c0_i32_1 = arith.constant 0 : i32
    return %c0_i32, %c0_i32_0 : i32, i32
  }
  func.func @transform_9(%arg0: i32) -> (i32, i32) {
    %c0_i32 = arith.constant 0 : i32
    %c0_i32_0 = arith.constant 0 : i32
    %c0_i32_1 = arith.constant 0 : i32
    return %c0_i32, %c0_i32_0 : i32, i32
  }
  func.func @transform_10(%arg0: i32) -> (i32, i32) {
    %c0_i32 = arith.constant 0 : i32
    %c0_i32_0 = arith.constant 0 : i32
    %c0_i32_1 = arith.constant 0 : i32
    return %c0_i32, %c0_i32_0 : i32, i32
  }
  func.func @transform_11(%arg0: i32) -> (i32, i32) {
    %c0_i32 = arith.constant 0 : i32
    %c0_i32_0 = arith.constant 0 : i32
    %c0_i32_1 = arith.constant 0 : i32
    return %c0_i32, %c0_i32_0 : i32, i32
  }
  func.func @transform_12(%arg0: i32) -> (i32, i32) {
    %c0_i32 = arith.constant 0 : i32
    %c0_i32_0 = arith.constant 0 : i32
    return %arg0, %c0_i32 : i32, i32
  }
}

</mosaic_0001>

<bundles_post_ra>
// kernel: tpu_custom_call.1
= control target key start
LH: loop header
LB: loop body
LE: loop exit
PB: predicated region body
PF: predicated region fallthrough
CT: control target
= control target key end

     0   :  { %v1084_v3 = vmov 0   ;;  %vm63_vm0 = vcmask 1044480   ;;  %vm59_vm1 = vcmask 80896   ;;  %s1542_s0 = inlined_call_operand.vmem [shape: f32[8,16,10], index: 0, kind: input, shape index: {}]   ;;  %s1543_s1 = inlined_call_operand.vmem [shape: f32[8,16,1], index: 1, kind: input, shape index: {}]   ;;  %s1544_s2 = inlined_call_operand.vmem [shape: bf16[10,32], index: 2, kind: input, shape index: {}]   ;;  %s1545_s3 = inlined_call_operand.vmem [shape: f32[1,32], index: 3, kind: input, shape index: {}]   ;;  %s1546_s4 = inlined_call_operand.vmem [shape: bf16[64,32], index: 4, kind: input, shape index: {}]   ;;  %s1547_s5 = inlined_call_operand.vmem [shape: f32[1,32], index: 5, kind: input, shape index: {}]   ;;  %s1548_s6 = inlined_call_operand.vmem [shape: bf16[32,32], index: 6, kind: input, shape index: {}]   ;;  %s1549_s7 = inlined_call_operand.vmem [shape: f32[1,32], index: 7, kind: input, shape index: {}]   ;;  %s1550_s8 = inlined_call_operand.vmem [shape: bf16[32,32], index: 8, kind: input, shape index: {}]   ;;  %s1551_s9 = inlined_call_operand.vmem [shape: f32[1,32], index: 9, kind: input, shape index: {}]   ;;  %s1552_s10 = inlined_call_operand.vmem [shape: bf16[32,32], index: 10, kind: input, shape index: {}]   ;;  %s1553_s11 = inlined_call_operand.vmem [shape: f32[1,32], index: 11, kind: input, shape index: {}]   ;;  %s1554_s12 = inlined_call_operand.hbm [shape: f32[16,32], index: 12, kind: output, shape index: {}]  }
   0x1   :  { %v938_v0 = vld [vmem:[%s1543_s1 + $0x10] sm:$0xff]  ;;  %v45_v1 = vld [vmem:[%s1543_s1] sm:$0xff]  ;;  %1046 = vset.pattern.permute.xlu1 %v1084_v3  ;;  %1045 = vset.pattern.permute.xlu0 %v1084_v3  ;;  %v44_v8 = vld [vmem:[%s1542_s0 + $0x8] sm:$0xff] }
   0x2   :  { %v933_v2 = vld [vmem:[%s1544_s2] sm:$0xf]  ;;  %v1029_v4 = vld [vmem:[%s1544_s2] sm:$0x10]  ;;  %123 = vperm.xlu1 %1046, %v938_v0   ;;  %85 = vperm.xlu0 %1045, %v45_v1   ;;  %v936_v9 = vld [vmem:[%s1542_s0 + $0x10] sm:$0xff] }
   0x3   :  { %v943_v5 = vld [vmem:[%s1543_s1 + $0x20] sm:$0xff]  ;;  %v934_v7 = vor.u32 %v1029_v4, %v933_v2  ;;  %v937_v10 = vld [vmem:[%s1542_s0 + $0x18] sm:$0xff]  ;;  %1047 = vset.pattern.permute.xlu2 %v1084_v3  ;;  %v942_v12 = vld [vmem:[%s1542_s0 + $0x28] sm:$0xff] }
   0x4   :  { %v43_v6 = vld [vmem:[%s1542_s0] sm:$0xff]  ;;  %v946_v13 = vld [vmem:[%s1542_s0 + $0x30] sm:$0xff]  ;;  %165 = vperm.xlu2 %1047, %v943_v5   ;;  %v101_v16 = vpack.c.bf16 %v937_v10, %v936_v9  ;;  %v947_v17 = vld [vmem:[%s1542_s0 + $0x38] sm:$0xff] }
   0x5   :  { %v941_v11 = vld [vmem:[%s1542_s0 + $0x20] sm:$0xff]  ;;  %v65_v14 = vsel %vm63_vm0, %v934_v7, 0  ;;  %v47_v15 = vpack.c.bf16 %v44_v8, %v43_v6  ;;  %v185_v19 = vpack.c.bf16 %v947_v17, %v946_v13  ;;  %v939_v20 = vld [vmem:[%s1543_s1 + $0x18] sm:$0xff]  ;;  %v46_v21 = vld [vmem:[%s1543_s1 + $0x8] sm:$0xff] }
   0x6   :  { %74 = vmatpush.bf16.msra.mxu0 %v65_v14  ;;  %112 = vmatpush.bf16.msra.mxu1 %v65_v14  ;;  %v143_v18 = vpack.c.bf16 %v942_v12, %v941_v11  ;;  %v944_v22 = vld [vmem:[%s1543_s1 + $0x28] sm:$0xff] }
   0x7   :  { %154 = vmatpush.bf16.msra.mxu2 %v65_v14  ;;  %196 = vmatpush.bf16.msra.mxu3 %v65_v14 }
   0x9   :  { %935 = vmatmul.msk.bf16.vlgmr.msra.gmra.mxu0 %vm59_vm1, %v47_v15  ;;  %940 = vmatmul.msk.bf16.vlgmr.msra.gmra.mxu1 %vm59_vm1, %v101_v16 }
   0xa   :  { %238 = vmatpush.bf16.msrb.mxu0 %v65_v14  ;;  %945 = vmatmul.msk.bf16.vlgmr.msra.gmra.mxu2 %vm59_vm1, %v143_v18 }
   0xb   :  { %322 = vmatpush.bf16.msrb.mxu2 %v65_v14  ;;  %950 = vmatmul.msk.bf16.vlgmr.msra.gmra.mxu3 %vm59_vm1, %v185_v19 }
   0xc   :  { %364 = vmatpush.bf16.msrb.mxu3 %v65_v14  ;;  %128 = vperm.xlu1 %1046, %v939_v20  }
   0xd   :  { %90 = vperm.xlu0 %1045, %v46_v21   ;;  %280 = vmatpush.bf16.msrb.mxu1 %v65_v14 }
   0xe   :  { %170 = vperm.xlu2 %1047, %v944_v22  }
   0xf   :  { %17 = vsyncpa [#allocation3], 0  ;;  %v949_v23 = vld [vmem:[%s1543_s1 + $0x38] sm:$0xff]  ;;  %v948_v24 = vld [vmem:[%s1543_s1 + $0x30] sm:$0xff]  ;;  %v135_v25 = vmax.f32 %v45_v1, %v938_v0  ;;  %v136_v40 = vmax.f32 %v46_v21, %v939_v20  ;;  %s1085_s2 = smov 32   ;;  %vm397_vm2 = vcmask 261120  }
  0x10   :  { %v953_v26 = vld [vmem:[%s1543_s1 + $0x40] sm:$0xff]  ;;  %v952_v28 = vld [vmem:[%s1542_s0 + $0x48] sm:$0xff]  ;;  %v956_v29 = vld [vmem:[%s1542_s0 + $0x50] sm:$0xff]  ;;  %vm437_vm3 = vcmask 523264   ;;  %s919_s17 = sshll.u32 %s1554_s12, 4  ;;  %s1088_s18 = smov 8   ;;  %s920_s17 = int_to_ptr.hbm [resolvable:$true] %s919_s17 }
  0x11   :  { %v951_v27 = vld [vmem:[%s1542_s0 + $0x40] sm:$0xff]  ;;  %v957_v30 = vld [vmem:[%s1542_s0 + $0x58] sm:$0xff]  ;;  %v962_v32 = vld [vmem:[%s1542_s0 + $0x68] sm:$0xff]  ;;  %v177_v35 = vmax.f32 %v135_v25, %v943_v5  ;;  %v178_v45 = vmax.f32 %v136_v40, %v944_v22 }
  0x12   :  { %v961_v31 = vld [vmem:[%s1542_s0 + $0x60] sm:$0xff]  ;;  %v966_v33 = vld [vmem:[%s1542_s0 + $0x70] sm:$0xff]  ;;  %v967_v34 = vld [vmem:[%s1542_s0 + $0x78] sm:$0xff]  ;;  %v227_v36 = vpack.c.bf16 %v952_v28, %v951_v27  ;;  %v269_v37 = vpack.c.bf16 %v957_v30, %v956_v29 }
  0x13   :  { %v311_v38 = vpack.c.bf16 %v962_v32, %v961_v31  ;;  %v353_v39 = vpack.c.bf16 %v967_v34, %v966_v33  ;;  %v958_v41 = vld [vmem:[%s1543_s1 + $0x50] sm:$0xff]  ;;  %v219_v42 = vmax.f32 %v177_v35, %v948_v24  ;;  %v954_v43 = vld [vmem:[%s1543_s1 + $0x48] sm:$0xff]  ;;  %v959_v44 = vld [vmem:[%s1543_s1 + $0x58] sm:$0xff]  ;;  %v220_v47 = vmax.f32 %v178_v45, %v949_v23 }
  0x14   :  { %212 = vperm.xlu1 %1046, %v949_v23   ;;  %v964_v48 = vld [vmem:[%s1543_s1 + $0x68] sm:$0xff]  ;;  %v963_v50 = vld [vmem:[%s1543_s1 + $0x60] sm:$0xff]  ;;  %v968_v51 = vld [vmem:[%s1543_s1 + $0x70] sm:$0xff] }
  0x15   :  { %207 = vperm.xlu0 %1045, %v948_v24   ;;  %v261_v46 = vmax.f32 %v219_v42, %v953_v26  ;;  %v262_v52 = vmax.f32 %v220_v47, %v954_v43  ;;  %v969_v56 = vld [vmem:[%s1543_s1 + $0x78] sm:$0xff]  ;;  %v1277_v2 = vld [vmem:[%s1545_s3] ss:$0 sm:$0xff]  ;;  %v1300_v18 = vld [vmem:[%s1546_s4 + $0x10] sm:$0xff] }
  0x16   :  { %249 = vperm.xlu2 %1047, %v953_v26   ;;  %v1291_v14 = vld [vmem:[%s1546_s4 + $0x18] sm:$0xff]  ;;  %v1320_v34 = vld [vmem:[%s1546_s4 + $0x8] sm:$0xff] }
  0x17   :  { %v303_v49 = vmax.f32 %v261_v46, %v958_v41  ;;  %v304_v54 = vmax.f32 %v262_v52, %v959_v44  ;;  %509 = vmatpush.bf16.msra.mxu2 %v1291_v14  ;;  %445 = vmatpush.bf16.msra.mxu0 %v1291_v14 }
  0x19   :  { %955 = vmatmul.msk.bf16.vlgmr.msrb.gmra.mxu0 %vm59_vm1, %v227_v36  ;;  %960 = vmatmul.msk.bf16.vlgmr.msrb.gmra.mxu1 %vm59_vm1, %v269_v37  ;;  %v345_v53 = vmax.f32 %v303_v49, %v963_v50  ;;  %v346_v57 = vmax.f32 %v304_v54, %v964_v48 }
  0x1a   :  { %965 = vmatmul.msk.bf16.vlgmr.msrb.gmra.mxu2 %vm59_vm1, %v311_v38 }
  0x1b   :  { %970 = vmatmul.msk.bf16.vlgmr.msrb.gmra.mxu3 %vm59_vm1, %v353_v39  ;;  %v387_v55 = vmax.f32 %v345_v53, %v968_v51  ;;  %v388_v58 = vmax.f32 %v346_v57, %v969_v56  ;;  %510 = vmatpush.bf16.msra.mxu2 %v1300_v18 }
  0x1c   :  { %291 = vperm.xlu1 %1046, %v958_v41   ;;  %446 = vmatpush.bf16.msra.mxu0 %v1300_v18 }
  0x1d   :  { %254 = vperm.xlu0 %1045, %v954_v43  }
  0x1e   :  { %296 = vperm.xlu2 %1047, %v959_v44  }
  0x1f   :  { %511 = vmatpush.bf16.msra.mxu2 %v1320_v34 }
  0x20   :  { %447 = vmatpush.bf16.msra.mxu0 %v1320_v34 }
  0x24   :  { %338 = vperm.xlu1 %1046, %v964_v48  }
  0x25   :  { %333 = vperm.xlu0 %1045, %v963_v50  }
  0x26   :  { %375 = vperm.xlu2 %1047, %v968_v51  }
  0x2d   :  { %380 = vperm.xlu0 %1045, %v969_v56  }
  0x2e   :  { %901 = vperm.xlu2 %1047, %v387_v55  }
  0x35   :  { %906 = vperm.xlu0 %1045, %v388_v58  }
  0x5e   :  { %v1268_v61 = vpop.permute.xlu2 %165 }
  0x68   :  { %v1279_v3 = vpop.permute.xlu2 %170 }
  0x70   :  { %v1302_v22 = vpop.permute.xlu2 %249 }
  0x74   :  { %v1264_v59 = vpop.permute.xlu0 %85  ;;  %v1266_v60 = vpop.permute.xlu1 %123 }
  0x78   :  { %v1355_v58 = vpop.permute.xlu2 %296 }
  0x7e   :  { %v1272_v1 = vpop.permute.xlu1 %128 }
  0x7f   :  { %v1270_v62 = vpop.permute.xlu0 %90 }
  0x86   :  { %v114_v63 = vpop.f32.mrf.mxu1  ;;  %v76_v0 = vpop.f32.mrf.mxu0 }
  0x87   :  { %v1281_v4 = vpop.permute.xlu0 %207  ;;  %v115_v8 = vadd.f32 %v1277_v2, %v114_v63  ;;  %v77_v9 = vadd.f32 %v1277_v2, %v76_v0  ;;  %v1293_v17 = vpop.permute.xlu1 %212 }
  0x89   :  { %v119_v15 = vmax.f32 %v115_v8, 0.0  ;;  %v81_v16 = vmax.f32 %v77_v9, 0.0 }
  0x8b   :  { %v1306_v27 = vmul.f32 %v1266_v60, %v119_v15  ;;  %v1309_v28 = vmul.f32 %v1264_v59, %v81_v16 }
  0x8d   :  { %v156_v5 = vpop.f32.mrf.mxu2  ;;  %v133_v39 = vmax.f32 %v1309_v28, %v1306_v27 }
  0x8e   :  { %v198_v6 = vpop.f32.mrf.mxu3  ;;  %v116_v7 = vpop.f32.mrf.mxu1  ;;  %v157_v11 = vadd.f32 %v1277_v2, %v156_v5 }
  0x8f   :  { %v78_v10 = vpop.f32.mrf.mxu0  ;;  %v117_v12 = vadd.f32 %v1277_v2, %v116_v7  ;;  %v199_v29 = vadd.f32 %v1277_v2, %v198_v6  ;;  %v1312_v30 = vpop.permute.xlu0 %254 }
  0x90   :  { %v79_v13 = vadd.f32 %v1277_v2, %v78_v10  ;;  %v161_v19 = vmax.f32 %v157_v11, 0.0  ;;  %v1347_v52 = vpop.permute.xlu1 %291 }
  0x91   :  { %v120_v23 = vmax.f32 %v117_v12, 0.0  ;;  %v203_v40 = vmax.f32 %v199_v29, 0.0 }
  0x92   :  { %v82_v24 = vmax.f32 %v79_v13, 0.0  ;;  %v1323_v35 = vmul.f32 %v1268_v61, %v161_v19 }
  0x93   :  { %v1326_v36 = vmul.f32 %v1272_v1, %v120_v23  ;;  %v1345_v51 = vmul.f32 %v1281_v4, %v203_v40 }
  0x94   :  { %v1329_v37 = vmul.f32 %v1270_v62, %v82_v24  ;;  %v175_v43 = vmax.f32 %v133_v39, %v1323_v35 }
  0x95   :  { %v158_v20 = vpop.f32.mrf.mxu2 }
  0x96   :  { %v200_v21 = vpop.f32.mrf.mxu3  ;;  %v159_v25 = vadd.f32 %v1277_v2, %v158_v20  ;;  %v282_v26 = vpop.f32.mrf.mxu1  ;;  %v134_v47 = vmax.f32 %v1329_v37, %v1326_v36  ;;  %v217_v63 = vmax.f32 %v175_v43, %v1345_v51 }
  0x97   :  { %v240_v31 = vpop.f32.mrf.mxu0  ;;  %v201_v38 = vadd.f32 %v1277_v2, %v200_v21  ;;  %v283_v44 = vadd.f32 %v1277_v2, %v282_v26  ;;  %v1358_v5 = vpop.permute.xlu0 %333 }
  0x98   :  { %v162_v32 = vmax.f32 %v159_v25, 0.0  ;;  %v241_v33 = vadd.f32 %v1277_v2, %v240_v31 }
  0x99   :  { %v204_v48 = vmax.f32 %v201_v38, 0.0  ;;  %v287_v0 = vmax.f32 %v283_v44, 0.0 }
  0x9a   :  { %v245_v41 = vmax.f32 %v241_v33, 0.0  ;;  %v1335_v42 = vmul.f32 %v1279_v3, %v162_v32  ;;  %v1382_v33 = vpop.permute.xlu1 %338 }
  0x9b   :  { %v1361_v6 = vmul.f32 %v1293_v17, %v204_v48  ;;  %v1370_v15 = vmul.f32 %v1347_v52, %v287_v0 }
  0x9c   :  { %v1350_v53 = vmul.f32 %v1302_v22, %v245_v41  ;;  %v176_v55 = vmax.f32 %v134_v47, %v1335_v42  ;;  %v1389_v41 = vpop.permute.xlu2 %375 }
  0x9d   :  { %v324_v45 = vpop.f32.mrf.mxu2 }
  0x9e   :  { %v366_v46 = vpop.f32.mrf.mxu3  ;;  %v325_v49 = vadd.f32 %v1277_v2, %v324_v45  ;;  %v284_v50 = vpop.f32.mrf.mxu1  ;;  %v259_v9 = vmax.f32 %v217_v63, %v1350_v53  ;;  %v218_v10 = vmax.f32 %v176_v55, %v1361_v6 }
  0x9f   :  { %v242_v54 = vpop.f32.mrf.mxu0  ;;  %v285_v56 = vadd.f32 %v1277_v2, %v284_v50  ;;  %v367_v11 = vadd.f32 %v1277_v2, %v366_v46 }
  0xa0   :  { %v243_v57 = vadd.f32 %v1277_v2, %v242_v54  ;;  %v329_v7 = vmax.f32 %v325_v49, 0.0  ;;  %v301_v25 = vmax.f32 %v259_v9, %v1370_v15  ;;  %v1030_v49 = vld [vmem:[%s1546_s4] sm:$0xff] }
  0xa1   :  { %v288_v12 = vmax.f32 %v285_v56, 0.0  ;;  %v371_v26 = vmax.f32 %v367_v11, 0.0  ;;  %512 = vmatpush.bf16.msra.mxu2 %v1030_v49  ;;  %448 = vmatpush.bf16.msra.mxu0 %v1030_v49 }
  0xa2   :  { %v246_v8 = vmax.f32 %v243_v57, 0.0  ;;  %v1373_v20 = vmul.f32 %v1358_v5, %v329_v7 }
  0xa3   :  { %v1380_v29 = vmul.f32 %v1355_v58, %v288_v12  ;;  %v1394_v43 = vmul.f32 %v1389_v41, %v371_v26 }
  0xa4   :  { %v1367_v13 = vmul.f32 %v1312_v30, %v246_v8  ;;  %v343_v38 = vmax.f32 %v301_v25, %v1373_v20 }
  0xa5   :  { %v326_v16 = vpop.f32.mrf.mxu2  ;;  %601 = vmatpush.bf16.msrb.mxu2 %v1291_v14  ;;  %555 = vmatpush.bf16.msrb.mxu0 %v1291_v14 }
  0xa6   :  { %v368_v19 = vpop.f32.mrf.mxu3  ;;  %v260_v21 = vmax.f32 %v218_v10, %v1367_v13  ;;  %v327_v23 = vadd.f32 %v1277_v2, %v326_v16  ;;  %v385_v46 = vmax.f32 %v343_v38, %v1394_v43  ;;  %v1035_v16 = vld [vmem:[%s1548_s6 + $0x8] sm:$0xff] }
  0xa7   :  { %v369_v24 = vadd.f32 %v1277_v2, %v368_v19  ;;  %v1391_v2 = vpop.permute.xlu0 %380  ;;  %531 = vmatpush.bf16.msra.mxu3 %v1035_v16  ;;  %487 = vmatpush.bf16.msra.mxu1 %v1035_v16  ;;  %v1034_v19 = vld [vmem:[%s1548_s6] sm:$0xff] }
  0xa8   :  { %v330_v31 = vmax.f32 %v327_v23, 0.0  ;;  %v302_v39 = vmax.f32 %v260_v21, %v1380_v29  ;;  %v1472_v21 = vld [vmem:[%s1547_s5] ss:$0 sm:$0xff] }
  0xa9   :  { %v372_v32 = vmax.f32 %v369_v24, 0.0  ;;  %602 = vmatpush.bf16.msrb.mxu2 %v1300_v18  ;;  %556 = vmatpush.bf16.msrb.mxu0 %v1300_v18 }
  0xaa   :  { %v1387_v40 = vmul.f32 %v1382_v33, %v330_v31 }
  0xab   :  { %v1398_v45 = vmul.f32 %v1391_v2, %v372_v32  ;;  %488 = vmatpush.bf16.msra.mxu1 %v1034_v19  ;;  %532 = vmatpush.bf16.msra.mxu3 %v1034_v19 }
  0xac   :  { %v344_v44 = vmax.f32 %v302_v39, %v1387_v40 }
  0xad   :  { %603 = vmatpush.bf16.msrb.mxu2 %v1320_v34  ;;  %557 = vmatpush.bf16.msrb.mxu0 %v1320_v34 }
  0xae   :  { %v386_v47 = vmax.f32 %v344_v44, %v1398_v45 }
  0xaf   :  { %623 = vmatpush.bf16.msrb.mxu3 %v1035_v16  ;;  %577 = vmatpush.bf16.msrb.mxu1 %v1035_v16 }
  0xb0   :  { %v1048_v48 = vpack.i.bf16 %v386_v47, %v385_v46 }
  0xb1   :  { %604 = vmatpush.bf16.msrb.mxu2 %v1030_v49  ;;  %558 = vmatpush.bf16.msrb.mxu0 %v1030_v49 }
  0xb2   :  { %1049 = vrot.lane.b32.xlu1 %v1048_v48, %s1085_s2 }
  0xb3   :  { %578 = vmatpush.bf16.msrb.mxu1 %v1034_v19  ;;  %624 = vmatpush.bf16.msrb.mxu3 %v1034_v19 }
 0x124   :  { %v1050_v50 = vpop.permute.xlu1 %1049 }
 0x125   :  { %v1052_v54 = vunpack.i.h.bf16 %v1050_v50  ;;  %v1051_v55 = vunpack.i.l.bf16 %v1050_v50 }
 0x127   :  { %v398_v56 = vsel %vm397_vm2, %v1309_v28, %v1051_v55  ;;  %v399_v57 = vsel %vm397_vm2, %v1329_v37, %v1052_v54  ;;  %v499_v63 = vsel %vm397_vm2, %v1306_v27, %v1051_v55  ;;  %v500_v0 = vsel %vm397_vm2, %v1326_v36, %v1052_v54 }
 0x128   :  { %v400_v7 = vpack.c.bf16 %v399_v57, %v398_v56  ;;  %v501_v8 = vpack.c.bf16 %v500_v0, %v499_v63  ;;  %v545_v27 = vsel %vm397_vm2, %v1323_v35, %v1051_v55  ;;  %v546_v28 = vsel %vm397_vm2, %v1335_v42, %v1052_v54 }
 0x129   :  { %v591_v36 = vsel %vm397_vm2, %v1345_v51, %v1051_v55  ;;  %v592_v37 = vsel %vm397_vm2, %v1361_v6, %v1052_v54  ;;  %v547_v9 = vpack.c.bf16 %v546_v28, %v545_v27  ;;  %v637_v35 = vsel %vm397_vm2, %v1350_v53, %v1051_v55 }
 0x12a   :  { %987 = vmatmul.msk.bf16.vlgmr.msra.gmra.mxu0 %vm437_vm3, %v400_v7  ;;  %997 = vmatmul.msk.bf16.vlgmr.msra.gmra.mxu2 %vm437_vm3, %v501_v8  ;;  %v593_v10 = vpack.c.bf16 %v592_v37, %v591_v36  ;;  %v638_v42 = vsel %vm397_vm2, %v1367_v13, %v1052_v54  ;;  %v683_v51 = vsel %vm397_vm2, %v1370_v15, %v1051_v55 }
 0x12b   :  { %693 = vmatpush.bf16.msra.mxu2 %v1291_v14  ;;  %647 = vmatpush.bf16.msra.mxu0 %v1291_v14  ;;  %v639_v6 = vpack.c.bf16 %v638_v42, %v637_v35  ;;  %v730_v53 = vsel %vm397_vm2, %v1387_v40, %v1052_v54  ;;  %v775_v11 = vsel %vm397_vm2, %v1394_v43, %v1051_v55 }
 0x12c   :  { %v776_v12 = vsel %vm397_vm2, %v1398_v45, %v1052_v54 }
 0x12d   :  { %v777_v15 = vpack.c.bf16 %v776_v12, %v775_v11 }
 0x12f   :  { %694 = vmatpush.bf16.msra.mxu2 %v1300_v18  ;;  %648 = vmatpush.bf16.msra.mxu0 %v1300_v18 }
 0x133   :  { %695 = vmatpush.bf16.msra.mxu2 %v1320_v34  ;;  %649 = vmatpush.bf16.msra.mxu0 %v1320_v34 }
 0x137   :  { %696 = vmatpush.bf16.msra.mxu2 %v1030_v49  ;;  %650 = vmatpush.bf16.msra.mxu0 %v1030_v49 }
 0x13a   :  { %999 = vmatmul.msk.bf16.vlgmr.msrb.gmra.mxu0 %vm437_vm3, %v547_v9  ;;  %1001 = vmatmul.msk.bf16.vlgmr.msrb.gmra.mxu2 %vm437_vm3, %v593_v10 }
 0x13b   :  { %785 = vmatpush.bf16.msrb.mxu2 %v1291_v14  ;;  %739 = vmatpush.bf16.msrb.mxu0 %v1291_v14  ;;  %v684_v14 = vsel %vm397_vm2, %v1380_v29, %v1052_v54 }
 0x13f   :  { %786 = vmatpush.bf16.msrb.mxu2 %v1300_v18  ;;  %740 = vmatpush.bf16.msrb.mxu0 %v1300_v18  ;;  %v685_v18 = vpack.c.bf16 %v684_v14, %v683_v51 }
 0x143   :  { %787 = vmatpush.bf16.msrb.mxu2 %v1320_v34  ;;  %741 = vmatpush.bf16.msrb.mxu0 %v1320_v34  ;;  %v729_v34 = vsel %vm397_vm2, %v1373_v20, %v1051_v55 }
 0x144   :  { %v731_v13 = vpack.c.bf16 %v730_v53, %v729_v34 }
 0x147   :  { %788 = vmatpush.bf16.msrb.mxu2 %v1030_v49  ;;  %742 = vmatpush.bf16.msrb.mxu0 %v1030_v49 }
 0x14a   :  { %1003 = vmatmul.msk.bf16.vlgmr.msra.gmra.mxu0 %vm437_vm3, %v639_v6  ;;  %1005 = vmatmul.msk.bf16.vlgmr.msra.gmra.mxu2 %vm437_vm3, %v685_v18 }
 0x15a   :  { %1007 = vmatmul.msk.bf16.vlgmr.msrb.gmra.mxu0 %vm437_vm3, %v731_v13  ;;  %1009 = vmatmul.msk.bf16.vlgmr.msrb.gmra.mxu2 %vm437_vm3, %v777_v15 }
 0x1a7   :  { %v450_v20 = vpop.f32.mrf.mxu0 }
 0x1a8   :  { %v451_v24 = vadd.f32 %v1472_v21, %v450_v20 }
 0x1aa   :  { %v455_v29 = vmax.f32 %v451_v24, 0.0 }
 0x1ad   :  { %v514_v23 = vpop.f32.mrf.mxu2 }
 0x1ae   :  { %v515_v32 = vadd.f32 %v1472_v21, %v514_v23 }
 0x1af   :  { %v452_v25 = vpop.f32.mrf.mxu0 }
 0x1b0   :  { %v453_v26 = vadd.f32 %v1472_v21, %v452_v25  ;;  %v519_v44 = vmax.f32 %v515_v32, 0.0 }
 0x1b2   :  { %v456_v31 = vmax.f32 %v453_v26, 0.0 }
 0x1b4   :  { %v457_v38 = vpack.c.bf16 %v456_v31, %v455_v29 }
 0x1b5   :  { %v516_v39 = vpop.f32.mrf.mxu2 }
 0x1b6   :  { %v517_v40 = vadd.f32 %v1472_v21, %v516_v39  ;;  %996 = vmatmul.msk.bf16.vlgmr.msra.gmra.mxu1 %vm397_vm2, %v457_v38 }
 0x1b7   :  { %v560_v43 = vpop.f32.mrf.mxu0  ;;  %669 = vmatpush.bf16.msra.mxu1 %v1035_v16 }
 0x1b8   :  { %v520_v45 = vmax.f32 %v517_v40, 0.0  ;;  %v561_v48 = vadd.f32 %v1472_v21, %v560_v43 }
 0x1ba   :  { %v521_v46 = vpack.c.bf16 %v520_v45, %v519_v44  ;;  %v565_v54 = vmax.f32 %v561_v48, 0.0 }
 0x1bb   :  { %670 = vmatpush.bf16.msra.mxu1 %v1034_v19 }
 0x1bc   :  { %998 = vmatmul.msk.bf16.vlgmr.msra.gmra.mxu3 %vm397_vm2, %v521_v46 }
 0x1bd   :  { %v606_v47 = vpop.f32.mrf.mxu2  ;;  %715 = vmatpush.bf16.msra.mxu3 %v1035_v16 }
 0x1be   :  { %v607_v56 = vadd.f32 %v1472_v21, %v606_v47 }
 0x1bf   :  { %v562_v49 = vpop.f32.mrf.mxu0 }
 0x1c0   :  { %v563_v50 = vadd.f32 %v1472_v21, %v562_v49  ;;  %v611_v8 = vmax.f32 %v607_v56, 0.0  ;;  %v1037_v49 = vld [vmem:[%s1550_s8 + $0x8] sm:$0xff] }
 0x1c1   :  { %716 = vmatpush.bf16.msra.mxu3 %v1034_v19  ;;  %851 = vmatpush.bf16.msra.mxu0 %v1037_v49  ;;  %v1039_v56 = vld [vmem:[%s1552_s10 + $0x8] sm:$0xff] }
 0x1c2   :  { %v566_v55 = vmax.f32 %v563_v50, 0.0 }
 0x1c4   :  { %v567_v57 = vpack.c.bf16 %v566_v55, %v565_v54  ;;  %v1036_v55 = vld [vmem:[%s1550_s8] sm:$0xff] }
 0x1c5   :  { %v608_v63 = vpop.f32.mrf.mxu2  ;;  %852 = vmatpush.bf16.msra.mxu0 %v1036_v55 }
 0x1c6   :  { %v609_v0 = vadd.f32 %v1472_v21, %v608_v63  ;;  %1000 = vmatmul.msk.bf16.vlgmr.msrb.gmra.mxu1 %vm397_vm2, %v567_v57  ;;  %v1055_v57 = vld [vmem:[%s1549_s7] ss:$0 sm:$0xff] }
 0x1c7   :  { %v652_v7 = vpop.f32.mrf.mxu0  ;;  %761 = vmatpush.bf16.msrb.mxu1 %v1035_v16 }
 0x1c8   :  { %v612_v27 = vmax.f32 %v609_v0, 0.0  ;;  %v653_v37 = vadd.f32 %v1472_v21, %v652_v7 }
 0x1ca   :  { %v613_v28 = vpack.c.bf16 %v612_v27, %v611_v8  ;;  %v657_v35 = vmax.f32 %v653_v37, 0.0 }
 0x1cb   :  { %762 = vmatpush.bf16.msrb.mxu1 %v1034_v19 }
 0x1cc   :  { %1002 = vmatmul.msk.bf16.vlgmr.msrb.gmra.mxu3 %vm397_vm2, %v613_v28 }
 0x1cd   :  { %v698_v36 = vpop.f32.mrf.mxu2  ;;  %807 = vmatpush.bf16.msrb.mxu3 %v1035_v16 }
 0x1ce   :  { %v699_v51 = vadd.f32 %v1472_v21, %v698_v36 }
 0x1cf   :  { %v654_v9 = vpop.f32.mrf.mxu0 }
 0x1d0   :  { %v655_v10 = vadd.f32 %v1472_v21, %v654_v9  ;;  %v703_v53 = vmax.f32 %v699_v51, 0.0 }
 0x1d1   :  { %808 = vmatpush.bf16.msrb.mxu3 %v1034_v19 }
 0x1d2   :  { %v658_v42 = vmax.f32 %v655_v10, 0.0 }
 0x1d4   :  { %v659_v14 = vpack.c.bf16 %v658_v42, %v657_v35 }
 0x1d5   :  { %v700_v6 = vpop.f32.mrf.mxu2 }
 0x1d6   :  { %v701_v18 = vadd.f32 %v1472_v21, %v700_v6  ;;  %1004 = vmatmul.msk.bf16.vlgmr.msra.gmra.mxu1 %vm397_vm2, %v659_v14 }
 0x1d7   :  { %v744_v34 = vpop.f32.mrf.mxu0  ;;  %891 = vmatpush.bf16.msra.mxu1 %v1039_v56 }
 0x1d8   :  { %v704_v11 = vmax.f32 %v701_v18, 0.0  ;;  %v745_v15 = vadd.f32 %v1472_v21, %v744_v34 }
 0x1da   :  { %v705_v12 = vpack.c.bf16 %v704_v11, %v703_v53  ;;  %v749_v20 = vmax.f32 %v745_v15, 0.0 }
 0x1dc   :  { %1006 = vmatmul.msk.bf16.vlgmr.msra.gmra.mxu3 %vm397_vm2, %v705_v12 }
 0x1dd   :  { %v790_v13 = vpop.f32.mrf.mxu2 }
 0x1de   :  { %v791_v24 = vadd.f32 %v1472_v21, %v790_v13 }
 0x1df   :  { %v746_v16 = vpop.f32.mrf.mxu0 }
 0x1e0   :  { %v747_v19 = vadd.f32 %v1472_v21, %v746_v16  ;;  %v795_v31 = vmax.f32 %v791_v24, 0.0 }
 0x1e2   :  { %v750_v23 = vmax.f32 %v747_v19, 0.0 }
 0x1e4   :  { %v751_v25 = vpack.c.bf16 %v750_v23, %v749_v20 }
 0x1e5   :  { %v792_v26 = vpop.f32.mrf.mxu2 }
 0x1e6   :  { %v793_v29 = vadd.f32 %v1472_v21, %v792_v26  ;;  %1008 = vmatmul.msk.bf16.vlgmr.msrb.gmra.mxu1 %vm397_vm2, %v751_v25 }
 0x1e8   :  { %v796_v32 = vmax.f32 %v793_v29, 0.0 }
 0x1ea   :  { %v797_v38 = vpack.c.bf16 %v796_v32, %v795_v31 }
 0x1ec   :  { %1010 = vmatmul.msk.bf16.vlgmr.msrb.gmra.mxu3 %vm397_vm2, %v797_v38 }
 0x233   :  { %v490_v39 = vpop.f32.mrf.mxu1 }
 0x234   :  { %v491_v8 = vadd.f32 %v1055_v57, %v490_v39 }
 0x236   :  { %v495_v51 = vmax.f32 %v491_v8, 0.0 }
 0x238   :  { %v497_v23 = vmul.f32 %v495_v51, %v1264_v59 }
 0x23b   :  { %v492_v40 = vpop.f32.mrf.mxu1 }
 0x23c   :  { %v493_v27 = vadd.f32 %v1055_v57, %v492_v40 }
 0x23e   :  { %v496_v14 = vmax.f32 %v493_v27, 0.0 }
 0x23f   :  { %v534_v43 = vpop.f32.mrf.mxu3 }
 0x240   :  { %v535_v0 = vadd.f32 %v1055_v57, %v534_v43  ;;  %v498_v24 = vmul.f32 %v496_v14, %v1270_v62  ;;  %v1057_v14 = vld [vmem:[%s1553_s11] ss:$0 sm:$0xff]  ;;  %s1087_s11 = smov 128  }
 0x242   :  { %v539_v9 = vmax.f32 %v535_v0, 0.0 }
 0x243   :  { %v580_v44 = vpop.f32.mrf.mxu1 }
 0x244   :  { %v581_v28 = vadd.f32 %v1055_v57, %v580_v44  ;;  %v541_v11 = vmul.f32 %v539_v9, %v1266_v60 }
 0x246   :  { %v585_v6 = vmax.f32 %v581_v28, 0.0  ;;  %v543_v39 = vmax.f32 %v497_v23, %v541_v11 }
 0x247   :  { %v536_v45 = vpop.f32.mrf.mxu3 }
 0x248   :  { %v537_v7 = vadd.f32 %v1055_v57, %v536_v45  ;;  %v587_v25 = vmul.f32 %v585_v6, %v1268_v61 }
 0x24a   :  { %v540_v10 = vmax.f32 %v537_v7, 0.0 }
 0x24b   :  { %v582_v46 = vpop.f32.mrf.mxu1 }
 0x24c   :  { %v583_v37 = vadd.f32 %v1055_v57, %v582_v46  ;;  %v542_v12 = vmul.f32 %v540_v10, %v1272_v1  ;;  %v589_v46 = vmax.f32 %v543_v39, %v587_v25 }
 0x24e   :  { %v586_v34 = vmax.f32 %v583_v37, 0.0  ;;  %v544_v1 = vmax.f32 %v498_v24, %v542_v12 }
 0x24f   :  { %v626_v47 = vpop.f32.mrf.mxu3 }
 0x250   :  { %v627_v35 = vadd.f32 %v1055_v57, %v626_v47  ;;  %v588_v31 = vmul.f32 %v586_v34, %v1279_v3  ;;  %v902_v34 = vpop.permute.xlu2 %901 }
 0x252   :  { %v631_v13 = vmax.f32 %v627_v35, 0.0  ;;  %v590_v61 = vmax.f32 %v544_v1, %v588_v31 }
 0x253   :  { %v672_v48 = vpop.f32.mrf.mxu1 }
 0x254   :  { %v673_v18 = vadd.f32 %v1055_v57, %v672_v48  ;;  %v633_v40 = vmul.f32 %v631_v13, %v1281_v4  ;;  %v907_v13 = vpop.permute.xlu0 %906 }
 0x256   :  { %v677_v26 = vmax.f32 %v673_v18, 0.0  ;;  %v635_v49 = vmax.f32 %v589_v46, %v633_v40 }
 0x257   :  { %v628_v21 = vpop.f32.mrf.mxu3 }
 0x258   :  { %v629_v42 = vadd.f32 %v1055_v57, %v628_v21  ;;  %v679_v62 = vmul.f32 %v677_v26, %v1302_v22 }
 0x25a   :  { %v632_v16 = vmax.f32 %v629_v42, 0.0  ;;  %v681_v55 = vmax.f32 %v635_v49, %v679_v62 }
 0x25b   :  { %v674_v50 = vpop.f32.mrf.mxu1 }
 0x25c   :  { %v675_v53 = vadd.f32 %v1055_v57, %v674_v50  ;;  %v634_v43 = vmul.f32 %v632_v16, %v1293_v17 }
 0x25e   :  { %v678_v32 = vmax.f32 %v675_v53, 0.0  ;;  %v636_v21 = vmax.f32 %v590_v61, %v634_v43 }
 0x25f   :  { %v718_v54 = vpop.f32.mrf.mxu3 }
 0x260   :  { %v719_v19 = vadd.f32 %v1055_v57, %v718_v54  ;;  %v680_v47 = vmul.f32 %v678_v32, %v1312_v30 }
 0x262   :  { %v723_v44 = vmax.f32 %v719_v19, 0.0  ;;  %v682_v56 = vmax.f32 %v636_v21, %v680_v47 }
 0x263   :  { %v764_v63 = vpop.f32.mrf.mxu1 }
 0x264   :  { %v765_v38 = vadd.f32 %v1055_v57, %v764_v63  ;;  %v725_v50 = vmul.f32 %v723_v44, %v1347_v52 }
 0x266   :  { %v769_v48 = vmax.f32 %v765_v38, 0.0  ;;  %v727_v7 = vmax.f32 %v681_v55, %v725_v50 }
 0x267   :  { %v720_v36 = vpop.f32.mrf.mxu3 }
 0x268   :  { %v721_v20 = vadd.f32 %v1055_v57, %v720_v36  ;;  %v771_v63 = vmul.f32 %v769_v48, %v1358_v5  ;;  %v1038_v5 = vld [vmem:[%s1552_s10] sm:$0xff]  ;;  %s1086_s10 = smov [#allocation2]  }
 0x269   :  { %892 = vmatpush.bf16.msra.mxu1 %v1038_v5 }
 0x26a   :  { %v724_v45 = vmax.f32 %v721_v20, 0.0  ;;  %v773_v28 = vmax.f32 %v727_v7, %v771_v63 }
 0x26b   :  { %v766_v15 = vpop.f32.mrf.mxu1 }
 0x26c   :  { %v767_v60 = vadd.f32 %v1055_v57, %v766_v15  ;;  %v726_v54 = vmul.f32 %v724_v45, %v1355_v58 }
 0x26e   :  { %v770_v3 = vmax.f32 %v767_v60, 0.0  ;;  %v728_v8 = vmax.f32 %v682_v56, %v726_v54 }
 0x26f   :  { %v810_v29 = vpop.f32.mrf.mxu3 }
 0x270   :  { %v811_v59 = vadd.f32 %v1055_v57, %v810_v29  ;;  %v772_v0 = vmul.f32 %v770_v3, %v1382_v33 }
 0x272   :  { %v815_v4 = vmax.f32 %v811_v59, 0.0  ;;  %v774_v36 = vmax.f32 %v728_v8, %v772_v0 }
 0x274   :  { %v817_v30 = vmul.f32 %v815_v4, %v1389_v41  ;;  %v1056_v41 = vld [vmem:[%s1551_s9] ss:$0 sm:$0xff]  ;;  %s917_s9 = sshll.u32 %s1086_s10, 4  ;;  %s918_s9 = int_to_ptr.vmem [resolvable:$true] %s917_s9 }
 0x276   :  { %v819_v37 = vmax.f32 %v773_v28, %v817_v30 }
 0x277   :  { %v812_v17 = vpop.f32.mrf.mxu3 }
 0x278   :  { %v813_v22 = vadd.f32 %v1055_v57, %v812_v17 }
 0x27a   :  { %v816_v27 = vmax.f32 %v813_v22, 0.0 }
 0x27c   :  { %v818_v52 = vmul.f32 %v816_v27, %v1391_v2 }
 0x27e   :  { %v820_v58 = vmax.f32 %v774_v36, %v818_v52 }
 0x280   :  { %v821_v9 = vpack.c.bf16 %v820_v58, %v819_v37 }
 0x282   :  { %1019 = vmatmul.msk.bf16.vlgmr.msra.gmra.mxu0 %vm397_vm2, %v821_v9 }
 0x2ff   :  { %v854_v33 = vpop.f32.mrf.mxu0 }
 0x300   :  { %v855_v57 = vadd.f32 %v1056_v41, %v854_v33 }
 0x302   :  { %v859_v42 = vmax.f32 %v855_v57, 0.0 }
 0x307   :  { %v856_v10 = vpop.f32.mrf.mxu0 }
 0x308   :  { %v857_v35 = vadd.f32 %v1056_v41, %v856_v10 }
 0x30a   :  { %v860_v2 = vmax.f32 %v857_v35, 0.0 }
 0x30c   :  { %v861_v51 = vpack.c.bf16 %v860_v2, %v859_v42 }
 0x30e   :  { %1028 = vmatmul.msk.bf16.vlgmr.msra.gmra.mxu1 %vm397_vm2, %v861_v51 }
 0x38b   :  { %v894_v6 = vpop.f32.mrf.mxu1 }
 0x38c   :  { %v895_v18 = vadd.f32 %v1057_v14, %v894_v6 }
 0x38e   :  { %v909_v53 = vmul.f32 %v902_v34, %v895_v18 }
 0x390   :  { %911 = vst.msk [vmem:[#allocation2] sm:$0xff] %vm397_vm2, %v909_v53 }
 0x393   :  { %v896_v11 = vpop.f32.mrf.mxu1 }
 0x394   :  { %v897_v12 = vadd.f32 %v1057_v14, %v896_v11 }
 0x396   :  { %v910_v15 = vmul.f32 %v907_v13, %v897_v12 }
 0x398   :  { %912 = vst.msk [vmem:[#allocation2 + $0x8] sm:$0xff] %vm397_vm2, %v910_v15 }
 0x399   :  { %925 = dma.vmem_to_hbm [thread:$0]  %s918_s9, 256, %s920_s17, [#allocation3], %s1087_s11, %s1087_s11, %s1088_s18  }
 0x39a   :  { %1082 = dma.done.wait [#allocation3], 256  }
 0x39b   :  { %1083 = vsyncadd [#allocation3], 4294967040 }
 0x39c   :  { %930 = vsyncpa [#allocation3], 1 }

</bundles_post_ra>
